<compile_context>
chip_gen: v5e
topology: v5e:2x2
jax: 0.10.0
libtpu: 0.0.40
codegen_flags: <defaults>
</compile_context>

<pallas_src>
import math

import jax
import jax.numpy as jnp
from jax.experimental import pallas as pl
from jax.experimental.pallas import tpu as pltpu


# ----------------------------------------------------------------------------
# Kernel
# ----------------------------------------------------------------------------
def _gelu_exact(x):
    # F.gelu default: exact erf formulation.
    return 0.5 * x * (1.0 + jax.lax.erf(x * (1.0 / math.sqrt(2.0))))


def _ffn_kernel(x_ref, w1_ref, b1_ref, w2_ref, b2_ref, o_ref, acc_ref):
    # Grid: (M tiles, d_ff chunks).  d_ff is the reduction axis (last, "arbitrary").
    j = pl.program_id(1)

    @pl.when(j == 0)
    def _init():
        acc_ref[...] = jnp.zeros_like(acc_ref)

    # (tm, D) @ (D, tf) -> (tm, tf) chunk of the hidden activation.
    h = jnp.dot(x_ref[...], w1_ref[...], preferred_element_type=jnp.float32)
    h = _gelu_exact(h + b1_ref[...])
    # dropout == identity (eval mode)

    # (tm, tf) @ (tf, D) accumulated into the resident output tile.
    acc_ref[...] += jnp.dot(h, w2_ref[...], preferred_element_type=jnp.float32)

    @pl.when(j == pl.num_programs(1) - 1)
    def _finalize():
        o_ref[...] = (acc_ref[...] + b2_ref[...]).astype(o_ref.dtype)


# ----------------------------------------------------------------------------
# Wrapper
# ----------------------------------------------------------------------------
def positionwise_feed_forward(x, w1, b1, w2, b2, *, tile_m=128, tile_ff=256):
    """x: (..., d_model).  w1: (d_model, d_ff), w2: (d_ff, d_model), biases (1, ·)."""
    orig_shape = x.shape
    d_model, d_ff = w1.shape
    assert orig_shape[-1] == d_model

    # Flatten all leading dims into one lane-dense M axis.
    x2 = x.reshape(-1, d_model)
    m = x2.shape[0]

    tm = tile_m
    m_pad = pl.cdiv(m, tm) * tm
    if m_pad != m:
        x2 = jnp.pad(x2, ((0, m_pad - m), (0, 0)))

    tf = tile_ff if d_ff % tile_ff == 0 else d_ff
    grid = (m_pad // tm, d_ff // tf)

    # VMEM budget hint: double-buffered tiles + accumulator scratch, with headroom.
    elt = 4
    tile_bytes = (tm * d_model        # x tile
                  + d_model * tf      # w1 chunk
                  + tf                # b1 chunk
                  + tf * d_model      # w2 chunk
                  + d_model           # b2
                  + tm * d_model      # out tile
                  ) * elt
    vmem_limit = min(96 * 1024 * 1024,
                     max(8 * 1024 * 1024, 2 * tile_bytes + tm * d_model * elt + (2 << 20)))

    out = pl.pallas_call(
        _ffn_kernel,
        out_shape=jax.ShapeDtypeStruct((m_pad, d_model), x.dtype),
        grid_spec=pltpu.PrefetchScalarGridSpec(
            num_scalar_prefetch=0,
            grid=grid,
            in_specs=[
                pl.BlockSpec((tm, d_model), lambda i, j: (i, 0)),   # x
                pl.BlockSpec((d_model, tf), lambda i, j: (0, j)),   # w1 chunk
                pl.BlockSpec((1, tf),       lambda i, j: (0, j)),   # b1 chunk
                pl.BlockSpec((tf, d_model), lambda i, j: (j, 0)),   # w2 chunk
                pl.BlockSpec((1, d_model),  lambda i, j: (0, 0)),   # b2
            ],
            out_specs=pl.BlockSpec((tm, d_model), lambda i, j: (i, 0)),
            scratch_shapes=[pltpu.VMEM((tm, d_model), jnp.float32)],
        ),
        compiler_params=pltpu.CompilerParams(
            dimension_semantics=("parallel", "arbitrary"),
            vmem_limit_bytes=int(vmem_limit),
        ),
    )(x2, w1, b1, w2, b2)

    return out[:m].reshape(orig_shape)


# ----------------------------------------------------------------------------
# Reference & parameter init (PyTorch nn.Linear-style uniform bounds)
# ----------------------------------------------------------------------------
def _reference(x, w1, b1, w2, b2):
    hp = jax.lax.Precision.HIGHEST
    h = jnp.einsum("...d,df->...f", x, w1, precision=hp) + b1.reshape(-1)
    h = _gelu_exact(h)
    return jnp.einsum("...f,fd->...d", h, w2, precision=hp) + b2.reshape(-1)


def _linear_params(key, d_in, d_out):
    kw, kb = jax.random.split(key)
    bound = 1.0 / math.sqrt(d_in)
    # Stored pre-transposed: (in, out) so the kernel computes x @ W + b.
    w = jax.random.uniform(kw, (d_in, d_out), jnp.float32, -bound, bound)
    b = jax.random.uniform(kb, (1, d_out), jnp.float32, -bound, bound)
    return w, b


# ----------------------------------------------------------------------------
# Main
# ----------------------------------------------------------------------------
if __name__ == "__main__":
    # Small but lane-dense shapes: M = B*S = 128 rows, d_model / d_ff are 128-multiples.
    B, S, d_model, d_ff = 2, 64, 128, 512

    root = jax.random.PRNGKey(0)
    kx, k1, k2 = jax.random.split(root, 3)

    x = jax.random.normal(kx, (B, S, d_model), jnp.float32)
    w1, b1 = _linear_params(k1, d_model, d_ff)
    w2, b2 = _linear_params(k2, d_ff, d_model)

    out = positionwise_feed_forward(x, w1, b1, w2, b2)
    out = jax.block_until_ready(out)

    ref = _reference(x, w1, b1, w2, b2)

    assert out.shape == x.shape
    assert bool(jnp.all(jnp.isfinite(out)))
    assert bool(jnp.allclose(out, ref, rtol=5e-3, atol=5e-3))
    print("KERNEL_OK")
</pallas_src>

<mosaic_0001>
module attributes {stable_mosaic.version = 11 : i64} {
  func.func @_ffn_kernel(%arg0: i32, %arg1: i32, %arg2: memref<128x128xf32, #tpu.memory_space<vmem>>, %arg3: memref<128x256xf32, #tpu.memory_space<vmem>>, %arg4: memref<1x256xf32, #tpu.memory_space<vmem>>, %arg5: memref<256x128xf32, #tpu.memory_space<vmem>>, %arg6: memref<1x128xf32, #tpu.memory_space<vmem>>, %arg7: memref<128x128xf32, #tpu.memory_space<vmem>>, %arg8: memref<128x128xf32, #tpu.memory_space<vmem>>) attributes {dimension_semantics = [#tpu.dimension_semantics<parallel>, #tpu.dimension_semantics<arbitrary>], iteration_bounds = array<i64: 1, 2>, scalar_prefetch = 0 : i64, scratch_operands = 1 : i64, tpu.core_type = #tpu.core_type<tc>, window_params = [{transform_indices = @transform_0, window_bounds = array<i64: 128, 128>}, {transform_indices = @transform_1, window_bounds = array<i64: 128, 256>}, {transform_indices = @transform_2, window_bounds = array<i64: 1, 256>}, {transform_indices = @transform_3, window_bounds = array<i64: 256, 128>}, {pipeline_mode = #tpu.pipeline_mode<synchronous>, transform_indices = @transform_4, window_bounds = array<i64: 1, 128>}, {transform_indices = @transform_5, window_bounds = array<i64: 128, 128>}]} {
    %c0_i32 = arith.constant 0 : i32
    %0 = arith.cmpi eq, %arg1, %c0_i32 : i32
    %1 = arith.extui %0 : i1 to i32
    %c0_i32_0 = arith.constant 0 : i32
    %2 = arith.cmpi ne, %1, %c0_i32_0 : i32
    scf.if %2 {
      %cst_17 = arith.constant 0.000000e+00 : f32
      %25 = vector.broadcast %cst_17 : f32 to vector<128x128xf32>
      %c0_18 = arith.constant 0 : index
      %c0_19 = arith.constant 0 : index
      %26 = vector.load %arg8[%c0_18, %c0_19] : memref<128x128xf32, #tpu.memory_space<vmem>>, vector<128x128xf32>
      tpu.vector_store %arg8[%c0_18, %c0_19], %25 {strides = array<i32>} : memref<128x128xf32, #tpu.memory_space<vmem>>, vector<128x128xf32>,
    } else {
    }
    %c0 = arith.constant 0 : index
    %c0_1 = arith.constant 0 : index
    %3 = vector.load %arg2[%c0, %c0_1] : memref<128x128xf32, #tpu.memory_space<vmem>>, vector<128x128xf32>
    %c0_2 = arith.constant 0 : index
    %c0_3 = arith.constant 0 : index
    %4 = vector.load %arg3[%c0_2, %c0_3] : memref<128x256xf32, #tpu.memory_space<vmem>>, vector<128x256xf32>
    %cst = arith.constant dense<0.000000e+00> : vector<128x256xf32>
    %5 = tpu.matmul %3, %4, %cst {dimension_numbers = #tpu.dot_dimension_numbers<[1], [0], [0], [1], [0, 0, 1, 1], [], []>} : vector<128x128xf32>, vector<128x256xf32>, vector<128x256xf32> -> vector<128x256xf32>
    %c0_4 = arith.constant 0 : index
    %c0_5 = arith.constant 0 : index
    %6 = vector.load %arg4[%c0_4, %c0_5] : memref<1x256xf32, #tpu.memory_space<vmem>>, vector<1x256xf32>
    %7 = vector.broadcast %6 : vector<1x256xf32> to vector<128x256xf32>
    %8 = arith.addf %5, %7 : vector<128x256xf32>
    %cst_6 = arith.constant 5.000000e-01 : f32
    %9 = vector.broadcast %cst_6 : f32 to vector<128x256xf32>
    %10 = arith.mulf %9, %8 : vector<128x256xf32>
    %cst_7 = arith.constant 0.707106769 : f32
    %11 = vector.broadcast %cst_7 : f32 to vector<128x256xf32>
    %12 = arith.mulf %8, %11 : vector<128x256xf32>
    %13 = math.erf %12 : vector<128x256xf32>
    %cst_8 = arith.constant 1.000000e+00 : f32
    %14 = vector.broadcast %cst_8 : f32 to vector<128x256xf32>
    %15 = arith.addf %14, %13 : vector<128x256xf32>
    %16 = arith.mulf %10, %15 : vector<128x256xf32>
    %c0_9 = arith.constant 0 : index
    %c0_10 = arith.constant 0 : index
    %17 = vector.load %arg8[%c0_9, %c0_10] : memref<128x128xf32, #tpu.memory_space<vmem>>, vector<128x128xf32>
    %c0_11 = arith.constant 0 : index
    %c0_12 = arith.constant 0 : index
    %18 = vector.load %arg5[%c0_11, %c0_12] : memref<256x128xf32, #tpu.memory_space<vmem>>, vector<256x128xf32>
    %cst_13 = arith.constant dense<0.000000e+00> : vector<128x128xf32>
    %19 = tpu.matmul %16, %18, %cst_13 {dimension_numbers = #tpu.dot_dimension_numbers<[1], [0], [0], [1], [0, 0, 1, 1], [], []>} : vector<128x256xf32>, vector<256x128xf32>, vector<128x128xf32> -> vector<128x128xf32>
    %20 = arith.addf %17, %19 : vector<128x128xf32>
    %c0_14 = arith.constant 0 : index
    %c0_15 = arith.constant 0 : index
    %21 = vector.load %arg8[%c0_14, %c0_15] : memref<128x128xf32, #tpu.memory_space<vmem>>, vector<128x128xf32>
    tpu.vector_store %arg8[%c0_14, %c0_15], %20 {strides = array<i32>} : memref<128x128xf32, #tpu.memory_space<vmem>>, vector<128x128xf32>,
    %c1_i32 = arith.constant 1 : i32
    %22 = arith.cmpi eq, %arg1, %c1_i32 : i32
    %23 = arith.extui %22 : i1 to i32
    %c0_i32_16 = arith.constant 0 : i32
    %24 = arith.cmpi ne, %23, %c0_i32_16 : i32
    scf.if %24 {
      %c0_17 = arith.constant 0 : index
      %c0_18 = arith.constant 0 : index
      %25 = vector.load %arg8[%c0_17, %c0_18] : memref<128x128xf32, #tpu.memory_space<vmem>>, vector<128x128xf32>
      %c0_19 = arith.constant 0 : index
      %c0_20 = arith.constant 0 : index
      %26 = vector.load %arg6[%c0_19, %c0_20] : memref<1x128xf32, #tpu.memory_space<vmem>>, vector<1x128xf32>
      %27 = vector.broadcast %26 : vector<1x128xf32> to vector<128x128xf32>
      %28 = arith.addf %25, %27 : vector<128x128xf32>
      %c0_21 = arith.constant 0 : index
      %c0_22 = arith.constant 0 : index
      %29 = vector.load %arg7[%c0_21, %c0_22] : memref<128x128xf32, #tpu.memory_space<vmem>>, vector<128x128xf32>
      tpu.vector_store %arg7[%c0_21, %c0_22], %28 {strides = array<i32>} : memref<128x128xf32, #tpu.memory_space<vmem>>, vector<128x128xf32>,
    } else {
    }
    return
  }
  func.func @transform_0(%arg0: i32, %arg1: i32) -> (i32, i32) {
    %c0_i32 = arith.constant 0 : i32
    %c0_i32_0 = arith.constant 0 : i32
    return %arg0, %c0_i32 : i32, i32
  }
  func.func @transform_1(%arg0: i32, %arg1: i32) -> (i32, i32) {
    %c0_i32 = arith.constant 0 : i32
    %c0_i32_0 = arith.constant 0 : i32
    return %c0_i32, %arg1 : i32, i32
  }
  func.func @transform_2(%arg0: i32, %arg1: i32) -> (i32, i32) {
    %c0_i32 = arith.constant 0 : i32
    %c0_i32_0 = arith.constant 0 : i32
    return %c0_i32, %arg1 : i32, i32
  }
  func.func @transform_3(%arg0: i32, %arg1: i32) -> (i32, i32) {
    %c0_i32 = arith.constant 0 : i32
    %c0_i32_0 = arith.constant 0 : i32
    return %arg1, %c0_i32 : i32, i32
  }
  func.func @transform_4(%arg0: i32, %arg1: i32) -> (i32, i32) {
    %c0_i32 = arith.constant 0 : i32
    %c0_i32_0 = arith.constant 0 : i32
    %c0_i32_1 = arith.constant 0 : i32
    return %c0_i32, %c0_i32_0 : i32, i32
  }
  func.func @transform_5(%arg0: i32, %arg1: i32) -> (i32, i32) {
    %c0_i32 = arith.constant 0 : i32
    %c0_i32_0 = arith.constant 0 : i32
    return %arg0, %c0_i32 : i32, i32
  }
}

</mosaic_0001>

<bundles_post_ra>
// kernel: tpu_custom_call.1
= control target key start
LH: loop header
LB: loop body
LE: loop exit
PB: predicated region body
PF: predicated region fallthrough
CT: control target
= control target key end

     0   :  { %s4301_s0 = inlined_call_operand.hbm [shape: f32[128,128], index: 0, kind: input, shape index: {}]   ;;  %s4302_s1 = inlined_call_operand.hbm [shape: f32[128,512], index: 1, kind: input, shape index: {}]   ;;  %s4303_s2 = inlined_call_operand.hbm [shape: f32[1,512], index: 2, kind: input, shape index: {}]   ;;  %s4304_s3 = inlined_call_operand.hbm [shape: f32[512,128], index: 3, kind: input, shape index: {}]   ;;  %s4305_s4 = inlined_call_operand.vmem [shape: f32[1,128], index: 4, kind: input, shape index: {}]   ;;  %s4306_s5 = inlined_call_operand.hbm [shape: f32[128,128], index: 5, kind: output, shape index: {}]  }
   0x1   :  { %4317 = sst [smem:[#allocation37_spill]] %s4301_s0 }
   0x2   :  { %4318 = sst [smem:[#allocation38_spill]] %s4302_s1 }
   0x3   :  { %10 = vsyncpa [#allocation4], 0 }
   0x4   :  { %11 = vsyncpa [#allocation7], 0 }
   0x5   :  { %13 = vsyncpa [#allocation7 + $0x1], 0 }
   0x6   :  { %14 = vsyncpa [#allocation10], 0 }
   0x7   :  { %16 = vsyncpa [#allocation10 + $0x1], 0 }
   0x8   :  { %17 = vsyncpa [#allocation5], 0  ;;  %s2833_s18 = smov 0   ;;  %s2835_s19 = smov 0  }
   0x9   :  { %s2837_s20 = smov 0   ;;  %s2839_s21 = smov 0  }
   0xa   :  { %s2841_s22 = smov 0   ;;  %s2843_s23 = smov 0  }
   0xb LB: > { %4319 = sst [smem:[#allocation16_spill]] %s2779_s20  ;;  %s32_s24 = sadd.s32 1, %s2787_s22  ;;  %s2791_s23 = sphi %s2843_s23, %s23_s23   ;;  %s2787_s22 = sphi %s2841_s22, %s4405_s22   ;;  %s2783_s21 = sphi %s2839_s21, %s4404_s21   ;;  %s2779_s20 = sphi %s2837_s20, %s4400_s20   ;;  %s2775_s19 = sphi %s2835_s19, %s4403_s19   ;;  %s2771_s18 = sphi %s2833_s18, %s4402_s18  }
   0xc   : > { %4320 = sst [smem:[#allocation17_spill]] %s2791_s23  ;;  %s68_s25 = sadd.s32 1, %s2779_s20 }
   0xd   : > { %p33_p0 = scmp.ge.s32.totalorder %s32_s24, 2  ;;  %p75_p1 = scmp.ne.s32.totalorder %s2779_s20, %s2775_s19 }
   0xe   : > { %p76_p2 = scmp.eq.s32.totalorder %s2791_s23, 0  ;;  %p2454_p4 = scmp.lt.s32.totalorder %s2791_s23, 2 }
   0xf   : > { %s4407_s24 = smov (%p33_p0, %s32_s24), 0  ;;  %s224_s28 = sand.u32 1, %s2791_s23  }
  0x10   : > { %4321 = sst [smem:[#allocation18_spill]] %s4407_s24  ;;  %p2870_p3 = por %p76_p2, %p75_p1 }
  0x11   : > { %s65_s27 = ssub.s32 %s2787_s22, %s4407_s24  ;;  %s2879_s29 = sand.u32 1, %s2779_s20  }
  0x12   : > { %p66_p5 = scmp.eq.s32.totalorder %s65_s27, 0  ;;  %s2423_s30 = sshll.u32 %s2787_s22, 4 }
  0x13   : > { %s4307_s7 = sshll.u32 %s2879_s29, 8  ;;  %s4324_s1 = sld [smem:[#allocation38_spill]] }
  0x14   : > { %s2883_s6 = scalar_select %p66_p5, %s2779_s20, %s68_s25  }
  0x15   : > { %s228_s12 = scalar_lea.vmem [#allocation6], %s4307_s7  ;;  %p2895_p6 = pnand %p2454_p4, %p2870_p3 }
  0x16   : > { %4323 = sst [smem:[#allocation19_spill]] %s2883_s6  ;;  %s236_s13 = sshll.u32 %s228_s12, 4  ;;  %s237_s13 = int_to_ptr.vmem [resolvable:$true] %s236_s13 }
  0x17   : > { %s2899_s15 = scalar_lea.sflag [#allocation7], %s224_s28  ;;  %s2793_s16 = smov 512  }
  0x18   : > { %s2794_s17 = smov 256   ;;  %s2795_s25 = smov 16  }
  0x19   : > { %s233_s10 = scalar_lea.hbm %s4324_s1, %s2423_s30  ;;  %s2905_s27 = sadd.s32 4294967295, %s2791_s23  }
  0x1a   : > { %s234_s11 = sshll.u32 %s233_s10, 4  ;;  %p81_p7 = scmp.ne.s32.totalorder %s2775_s19, %s2771_s18  ;;  %s235_s11 = int_to_ptr.hbm [resolvable:$true] %s234_s11 }
  0x1b   : > { %2446 = dma.hbm_to_vmem [thread:$0]  (!%p2895_p6), %s235_s11, 4096, %s237_s13, %s2899_s15, %s2793_s16, %s2794_s17, %s2795_s25  }
  0x1c   : > { %p82_p8 = scmp.eq.s32.totalorder %s2905_s27, 0  ;;  %p2369_p9 = scmp.ge.s32.totalorder %s2791_s23, 1 }
  0x1d   : > { %p191_p10 = scmp.lt.s32.totalorder %s2791_s23, 3  ;;  %s4327_s0 = sld [smem:[#allocation37_spill]] }
  0x1e   : > { %p2914_p11 = por %p82_p8, %p81_p7  ;;  %s2796_s18 = smov [#allocation3]  }
  0x1f   : > { %p2921_p12 = pnand %p2369_p9, %p191_p10  ;;  %s207_s10 = sshll.u32 %s2796_s18, 4  ;;  %s208_s10 = int_to_ptr.vmem [resolvable:$true] %s207_s10 }
  0x20   : > { %s2375_s11 = sshll.u32 %s2879_s29, 1  ;;  %s2376_s12 = sshll.u32 %s2787_s22, 1 }
  0x21   : > { %p2439_p13 = pneg %p2921_p12  ;;  %s254_s17 = scalar_lea.hbm %s4303_s2, %s2376_s12 }
  0x22   : > { %s2797_s25 = smov 128   ;;  %s2798_s28 = smov 8  }
  0x23   : > { %s205_s8 = sshll.u32 %s4327_s0, 4  ;;  %p2440_p0 = pnand %p2439_p13, %p82_p8  ;;  %s206_s8 = int_to_ptr.hbm [resolvable:$true] %s205_s8 }
  0x24   : > { %s256_s30 = sshll.u32 %s254_s17, 4  ;;  %s250_s7 = scalar_lea.vmem [#allocation8], %s2375_s11  ;;  %s257_s30 = int_to_ptr.hbm [resolvable:$true] %s256_s30 }
  0x25   : > { %2442 = dma.hbm_to_vmem [thread:$0]  (!%p2440_p0), %s206_s8, 2048, %s208_s10, [#allocation4], %s2797_s25, %s2797_s25, %s2798_s28  }
  0x26   : > { %s258_s0 = sshll.u32 %s250_s7, 4  ;;  %s2424_s18 = sshll.u32 %s2787_s22, 8  ;;  %s259_s0 = int_to_ptr.vmem [resolvable:$true] %s258_s0 }
  0x27   : > { %2449 = dma.hbm_to_vmem [thread:$0]  (!%p2895_p6), %s257_s30, 32, %s259_s0, %s2899_s15  }
  0x28   : > { %s4329_s1 = sshll.u32 %s2879_s29, 8  ;;  %s274_s12 = scalar_lea.hbm %s4304_s3, %s2424_s18 }
  0x29   : > { %s269_s24 = scalar_lea.vmem [#allocation9], %s4329_s1  ;;  %s275_s13 = sshll.u32 %s274_s12, 4  ;;  %s276_s13 = int_to_ptr.hbm [resolvable:$true] %s275_s13 }
  0x2a   : > { %s277_s6 = sshll.u32 %s269_s24, 4  ;;  %s266_s16 = scalar_lea.sflag [#allocation10], %s2879_s29  ;;  %s278_s6 = int_to_ptr.vmem [resolvable:$true] %s277_s6 }
  0x2b   : > { %2452 = dma.hbm_to_vmem [thread:$0]  (!%p2895_p6), %s276_s13, 4096, %s278_s6, %s266_s16, %s2797_s25, %s2797_s25, %s2798_s28  }
  0x2c   : > { %289 = sbr.rel (%p2921_p12) target bundleno = 769 (0x301), region = 40 }
  0x31   : > { %2754 = dma.done.wait (%p82_p8), [#allocation4], 2048  }
  0x32   : > { %2756 = vsyncadd (%p82_p8), [#allocation4], 4294965248  ;;  %s296_s0 = sand.u32 1, %s2905_s27   ;;  %s298_s1 = sand.u32 1, %s2775_s19  }
  0x33   : > { %s2382_s20 = sshll.u32 %s298_s1, 8  ;;  %s297_s23 = scalar_lea.sflag [#allocation7], %s296_s0 }
  0x34   : > { %s2954_s24 = scalar_lea.vmem [#allocation6], %s2382_s20 }
  0x35   : > { %2758 = dma.done.wait (%p2914_p11), %s297_s23, 4128  }
  0x36   : > { %2760 = vsyncadd (%p2914_p11), %s297_s23, 4294963168  ;;  %s2383_s29 = sshll.u32 %s298_s1, 1  ;;  %s317_s7 = scalar_lea.sflag [#allocation10], %s298_s1 }
  0x37   : > { %s2960_s6 = scalar_lea.vmem [#allocation8], %s2383_s29  ;;  %s2962_s14 = scalar_lea.vmem [#allocation9], %s2382_s20 }
  0x38   : > { %2762 = dma.done.wait (%p2914_p11), %s317_s7, 4096  }
  0x39   : > { %2764 = vsyncadd (%p2914_p11), %s317_s7, 4294963200  ;;  %p2385_p1 = scmp.ne.s32.totalorder %s2783_s21, 0 }
  0x3b   : > { %361 = sbr.rel (%p2385_p1) target bundleno = 81 (0x51), region = 60 }
  0x40   : > { %v2799_v0 = vmov 0.0  }
  0x41   : > { %362 = vst [vmem:[#allocation2 + $0x30] sm:$0xff] %v2799_v0 }
  0x42   : > { %363 = vst [vmem:[#allocation2] sm:$0xff] %v2799_v0 }
  0x43   : > { %364 = vst [vmem:[#allocation2 + $0x58] sm:$0xff] %v2799_v0 }
  0x44   : > { %365 = vst [vmem:[#allocation2 + $0x18] sm:$0xff] %v2799_v0 }
  0x45   : > { %366 = vst [vmem:[#allocation2 + $0x50] sm:$0xff] %v2799_v0 }
  0x46   : > { %367 = vst [vmem:[#allocation2 + $0x68] sm:$0xff] %v2799_v0 }
  0x47   : > { %368 = vst [vmem:[#allocation2 + $0x8] sm:$0xff] %v2799_v0 }
  0x48   : > { %369 = vst [vmem:[#allocation2 + $0x48] sm:$0xff] %v2799_v0 }
  0x49   : > { %370 = vst [vmem:[#allocation2 + $0x40] sm:$0xff] %v2799_v0 }
  0x4a   : > { %371 = vst [vmem:[#allocation2 + $0x20] sm:$0xff] %v2799_v0 }
  0x4b   : > { %372 = vst [vmem:[#allocation2 + $0x10] sm:$0xff] %v2799_v0 }
  0x4c   : > { %373 = vst [vmem:[#allocation2 + $0x38] sm:$0xff] %v2799_v0 }
  0x4d   : > { %374 = vst [vmem:[#allocation2 + $0x60] sm:$0xff] %v2799_v0 }
  0x4e   : > { %375 = vst [vmem:[#allocation2 + $0x70] sm:$0xff] %v2799_v0 }
  0x4f   : > { %376 = vst [vmem:[#allocation2 + $0x78] sm:$0xff] %v2799_v0 }
  0x50   : > { %377 = vst [vmem:[#allocation2 + $0x28] sm:$0xff] %v2799_v0 }
  0x51 PF: > { %v424_v1 = vld [vmem:[%s2954_s24 + $0xf0] sm:$0xff]  ;;  %v425_v2 = vld [vmem:[%s2954_s24 + $0xf8] sm:$0xff]  ;;  %v422_v3 = vld [vmem:[%s2954_s24 + $0xe0] sm:$0xff]  ;;  %p2418_p2 = scmp.ne.s32.totalorder %s2783_s21, 1 }
  0x52   : > { %432 = vmatpush.msra.mxu0 %v424_v1  ;;  %497 = vmatpush.msra.mxu1 %v425_v2  ;;  %v423_v4 = vld [vmem:[%s2954_s24 + $0xe8] sm:$0xff]  ;;  %v420_v5 = vld [vmem:[%s2954_s24 + $0xd0] sm:$0xff]  ;;  %v421_v6 = vld [vmem:[%s2954_s24 + $0xd8] sm:$0xff] }
  0x53   : > { %v418_v7 = vld [vmem:[%s2954_s24 + $0xc0] sm:$0xff]  ;;  %v419_v8 = vld [vmem:[%s2954_s24 + $0xc8] sm:$0xff]  ;;  %v416_v9 = vld [vmem:[%s2954_s24 + $0xb0] sm:$0xff] }
  0x54   : > { %433 = vmatpush.msra.mxu0 %v422_v3  ;;  %498 = vmatpush.msra.mxu1 %v423_v4  ;;  %v417_v10 = vld [vmem:[%s2954_s24 + $0xb8] sm:$0xff]  ;;  %v414_v11 = vld [vmem:[%s2954_s24 + $0xa0] sm:$0xff]  ;;  %v415_v12 = vld [vmem:[%s2954_s24 + $0xa8] sm:$0xff] }
  0x55   : > { %v412_v13 = vld [vmem:[%s2954_s24 + $0x90] sm:$0xff]  ;;  %v413_v14 = vld [vmem:[%s2954_s24 + $0x98] sm:$0xff]  ;;  %v410_v15 = vld [vmem:[%s2954_s24 + $0x80] sm:$0xff] }
  0x56   : > { %434 = vmatpush.msra.mxu0 %v420_v5  ;;  %499 = vmatpush.msra.mxu1 %v421_v6  ;;  %v411_v16 = vld [vmem:[%s2954_s24 + $0x88] sm:$0xff]  ;;  %v408_v17 = vld [vmem:[%s2954_s24 + $0x70] sm:$0xff]  ;;  %v409_v18 = vld [vmem:[%s2954_s24 + $0x78] sm:$0xff] }
  0x57   : > { %v406_v19 = vld [vmem:[%s2954_s24 + $0x60] sm:$0xff]  ;;  %v407_v20 = vld [vmem:[%s2954_s24 + $0x68] sm:$0xff]  ;;  %v404_v21 = vld [vmem:[%s2954_s24 + $0x50] sm:$0xff] }
  0x58   : > { %435 = vmatpush.msra.mxu0 %v418_v7  ;;  %500 = vmatpush.msra.mxu1 %v419_v8  ;;  %v405_v22 = vld [vmem:[%s2954_s24 + $0x58] sm:$0xff]  ;;  %v402_v23 = vld [vmem:[%s2954_s24 + $0x40] sm:$0xff]  ;;  %v403_v24 = vld [vmem:[%s2954_s24 + $0x48] sm:$0xff] }
  0x59   : > { %v400_v25 = vld [vmem:[%s2954_s24 + $0x30] sm:$0xff]  ;;  %v401_v26 = vld [vmem:[%s2954_s24 + $0x38] sm:$0xff]  ;;  %v398_v27 = vld [vmem:[%s2954_s24 + $0x20] sm:$0xff] }
  0x5a   : > { %436 = vmatpush.msra.mxu0 %v416_v9  ;;  %501 = vmatpush.msra.mxu1 %v417_v10  ;;  %v399_v28 = vld [vmem:[%s2954_s24 + $0x28] sm:$0xff]  ;;  %v396_v29 = vld [vmem:[%s2954_s24 + $0x10] sm:$0xff]  ;;  %v397_v30 = vld [vmem:[%s2954_s24 + $0x18] sm:$0xff] }
  0x5b   : > { %v394_v31 = vld [vmem:[%s2954_s24] sm:$0xff]  ;;  %v395_v32 = vld [vmem:[%s2954_s24 + $0x8] sm:$0xff]  ;;  %v380_v35 = vld [vmem:[#allocation3 + $0x10] sm:$0xff] }
  0x5c   : > { %437 = vmatpush.msra.mxu0 %v414_v11  ;;  %502 = vmatpush.msra.mxu1 %v415_v12  ;;  %v378_v33 = vld [vmem:[#allocation3] sm:$0xff]  ;;  %v379_v34 = vld [vmem:[#allocation3 + $0x8] sm:$0xff]  ;;  %v381_v36 = vld [vmem:[#allocation3 + $0x18] sm:$0xff] }
  0x5d   : > { %v382_v37 = vld [vmem:[#allocation3 + $0x20] sm:$0xff]  ;;  %v383_v38 = vld [vmem:[#allocation3 + $0x28] sm:$0xff]  ;;  %v384_v39 = vld [vmem:[#allocation3 + $0x30] sm:$0xff] }
  0x5e   : > { %438 = vmatpush.msra.mxu0 %v412_v13  ;;  %503 = vmatpush.msra.mxu1 %v413_v14  ;;  %v385_v40 = vld [vmem:[#allocation3 + $0x38] sm:$0xff]  ;;  %v386_v41 = vld [vmem:[#allocation3 + $0x40] sm:$0xff]  ;;  %v387_v42 = vld [vmem:[#allocation3 + $0x48] sm:$0xff] }
  0x5f   : > { %v388_v43 = vld [vmem:[#allocation3 + $0x50] sm:$0xff]  ;;  %v389_v44 = vld [vmem:[#allocation3 + $0x58] sm:$0xff]  ;;  %v390_v45 = vld [vmem:[#allocation3 + $0x60] sm:$0xff] }
  0x60   : > { %439 = vmatpush.msra.mxu0 %v410_v15  ;;  %504 = vmatpush.msra.mxu1 %v411_v16  ;;  %v391_v46 = vld [vmem:[#allocation3 + $0x68] sm:$0xff]  ;;  %v392_v47 = vld [vmem:[#allocation3 + $0x70] sm:$0xff]  ;;  %v393_v48 = vld [vmem:[#allocation3 + $0x78] sm:$0xff] }
  0x61   : > { %v2001_v49 = vld [vmem:[%s2962_s14 + $0x78] sm:$0xff]  ;;  %v2000_v52 = vld [vmem:[%s2962_s14 + $0x70] sm:$0xff]  ;;  %v1999_v56 = vld [vmem:[%s2962_s14 + $0x68] sm:$0xff] }
  0x62   : > { %440 = vmatpush.msra.mxu0 %v408_v17  ;;  %505 = vmatpush.msra.mxu1 %v409_v18  ;;  %v2017_v50 = vld [vmem:[%s2962_s14 + $0xf8] sm:$0xff]  ;;  %v2016_v53 = vld [vmem:[%s2962_s14 + $0xf0] sm:$0xff]  ;;  %v2015_v57 = vld [vmem:[%s2962_s14 + $0xe8] sm:$0xff] }
  0x63   : > { %2018 = vmatpush.msra.mxu2 %v2001_v49  ;;  %2083 = vmatpush.msra.mxu3 %v2017_v50  ;;  %v426_v51 = vld [vmem:[%s2960_s6] sm:$0x3]  ;;  %v1998_v60 = vld [vmem:[%s2962_s14 + $0x60] sm:$0xff]  ;;  %v1996_v6 = vld [vmem:[%s2962_s14 + $0x50] sm:$0xff] }
  0x64   : > { %441 = vmatpush.msra.mxu0 %v406_v19  ;;  %506 = vmatpush.msra.mxu1 %v407_v20  ;;  %v3006_v54 = vperm.slane %v426_v51, 0  ;;  %v3008_v55 = vperm.slane %v426_v51, 1  ;;  %v2014_v61 = vld [vmem:[%s2962_s14 + $0xe0] sm:$0xff]  ;;  %v1997_v0 = vld [vmem:[%s2962_s14 + $0x58] sm:$0xff]  ;;  %v2012_v7 = vld [vmem:[%s2962_s14 + $0xd0] sm:$0xff] }
  0x65   : > { %2019 = vmatpush.msra.mxu2 %v2000_v52  ;;  %2084 = vmatpush.msra.mxu3 %v2016_v53  ;;  %v2013_v1 = vld [vmem:[%s2962_s14 + $0xd8] sm:$0xff]  ;;  %v1995_v9 = vld [vmem:[%s2962_s14 + $0x48] sm:$0xff]  ;;  %v1994_v16 = vld [vmem:[%s2962_s14 + $0x40] sm:$0xff] }
  0x66   : > { %442 = vmatpush.msra.mxu0 %v404_v21  ;;  %507 = vmatpush.msra.mxu1 %v405_v22  ;;  %v2011_v10 = vld [vmem:[%s2962_s14 + $0xc8] sm:$0xff]  ;;  %v2010_v17 = vld [vmem:[%s2962_s14 + $0xc0] sm:$0xff]  ;;  %v1993_v22 = vld [vmem:[%s2962_s14 + $0x38] sm:$0xff] }
  0x67   : > { %2020 = vmatpush.msra.mxu2 %v1999_v56  ;;  %2085 = vmatpush.msra.mxu3 %v2015_v57  ;;  %v1989_v51 = vld [vmem:[%s2962_s14 + $0x18] sm:$0xff] }
  0x68   : > { %443 = vmatpush.msra.mxu0 %v402_v23  ;;  %508 = vmatpush.msra.mxu1 %v403_v24  ;;  %v2009_v23 = vld [vmem:[%s2962_s14 + $0xb8] sm:$0xff] }
  0x69   : > { %2021 = vmatpush.msra.mxu2 %v1998_v60  ;;  %2086 = vmatpush.msra.mxu3 %v2014_v61  ;;  %v2005_v52 = vld [vmem:[%s2962_s14 + $0x98] sm:$0xff] }
  0x6a   : > { %444 = vmatpush.msra.mxu0 %v400_v25  ;;  %509 = vmatpush.msra.mxu1 %v401_v26  ;;  %v1992_v25 = vld [vmem:[%s2962_s14 + $0x30] sm:$0xff] }
  0x6b   : > { %2022 = vmatpush.msra.mxu2 %v1997_v0  ;;  %2087 = vmatpush.msra.mxu3 %v2013_v1  ;;  %v2008_v26 = vld [vmem:[%s2962_s14 + $0xb0] sm:$0xff] }
  0x6c   : > { %445 = vmatpush.msra.mxu0 %v398_v27  ;;  %510 = vmatpush.msra.mxu1 %v399_v28  ;;  %v1988_v0 = vld [vmem:[%s2962_s14 + $0x10] sm:$0xff] }
  0x6d   : > { %2023 = vmatpush.msra.mxu2 %v1996_v6  ;;  %2088 = vmatpush.msra.mxu3 %v2012_v7  ;;  %v2004_v6 = vld [vmem:[%s2962_s14 + $0x90] sm:$0xff] }
  0x6e   : > { %446 = vmatpush.msra.mxu0 %v396_v29  ;;  %511 = vmatpush.msra.mxu1 %v397_v30  ;;  %v1991_v30 = vld [vmem:[%s2962_s14 + $0x28] sm:$0xff] }
  0x6f   : > { %2024 = vmatpush.msra.mxu2 %v1995_v9  ;;  %2089 = vmatpush.msra.mxu3 %v2011_v10 }
  0x70   : > { %447 = vmatpush.msra.mxu0 %v394_v31  ;;  %512 = vmatpush.msra.mxu1 %v395_v32  ;;  %v2007_v31 = vld [vmem:[%s2962_s14 + $0xa8] sm:$0xff] }
  0x71   : > { %448 = vmatmul.f32.vlgmr.msra.gmra.mxu0 %v378_v33  ;;  %513 = vmatmul.f32.vlgmr.msra.gmra.mxu1 %v378_v33 }
  0x72   : > { %2025 = vmatpush.msra.mxu2 %v1994_v16  ;;  %2090 = vmatpush.msra.mxu3 %v2010_v17 }
  0x74   : > { %2026 = vmatpush.msra.mxu2 %v1993_v22  ;;  %2091 = vmatpush.msra.mxu3 %v2009_v23 }
  0x76   : > { %2027 = vmatpush.msra.mxu2 %v1992_v25  ;;  %2092 = vmatpush.msra.mxu3 %v2008_v26  ;;  %v2002_v25 = vld [vmem:[%s2962_s14 + $0x80] sm:$0xff] }
  0x78   : > { %2028 = vmatpush.msra.mxu2 %v1991_v30  ;;  %2093 = vmatpush.msra.mxu3 %v2007_v31 }
  0x79   : > { %451 = vmatmul.f32.gmra.mxu0 %v379_v34  ;;  %516 = vmatmul.f32.gmra.mxu1 %v379_v34 }
  0x81   : > { %454 = vmatmul.f32.gmra.mxu0 %v380_v35  ;;  %519 = vmatmul.f32.gmra.mxu1 %v380_v35 }
  0x89   : > { %457 = vmatmul.f32.gmra.mxu0 %v381_v36  ;;  %522 = vmatmul.f32.gmra.mxu1 %v381_v36 }
  0x91   : > { %460 = vmatmul.f32.gmra.mxu0 %v382_v37  ;;  %525 = vmatmul.f32.gmra.mxu1 %v382_v37 }
  0x99   : > { %463 = vmatmul.f32.gmra.mxu0 %v383_v38  ;;  %528 = vmatmul.f32.gmra.mxu1 %v383_v38 }
  0xa1   : > { %466 = vmatmul.f32.gmra.mxu0 %v384_v39  ;;  %531 = vmatmul.f32.gmra.mxu1 %v384_v39 }
  0xa9   : > { %469 = vmatmul.f32.gmra.mxu0 %v385_v40  ;;  %534 = vmatmul.f32.gmra.mxu1 %v385_v40 }
  0xb1   : > { %472 = vmatmul.f32.gmra.mxu0 %v386_v41  ;;  %537 = vmatmul.f32.gmra.mxu1 %v386_v41  ;;  %v1990_v41 = vld [vmem:[%s2962_s14 + $0x20] sm:$0xff] }
  0xb2   : > { %2029 = vmatpush.msra.mxu2 %v1990_v41 }
  0xb4   : > { %2030 = vmatpush.msra.mxu2 %v1989_v51 }
  0xb6   : > { %2031 = vmatpush.msra.mxu2 %v1988_v0 }
  0xb9   : > { %475 = vmatmul.f32.gmra.mxu0 %v387_v42  ;;  %540 = vmatmul.f32.gmra.mxu1 %v387_v42  ;;  %v2006_v42 = vld [vmem:[%s2962_s14 + $0xa0] sm:$0xff] }
  0xba   : > { %2094 = vmatpush.msra.mxu3 %v2006_v42 }
  0xbc   : > { %2095 = vmatpush.msra.mxu3 %v2005_v52 }
  0xbe   : > { %2096 = vmatpush.msra.mxu3 %v2004_v6 }
  0xc1   : > { %478 = vmatmul.f32.gmra.mxu0 %v388_v43  ;;  %543 = vmatmul.f32.gmra.mxu1 %v388_v43 }
  0xc9   : > { %481 = vmatmul.f32.gmra.mxu0 %v389_v44  ;;  %546 = vmatmul.f32.gmra.mxu1 %v389_v44 }
  0xd1   : > { %484 = vmatmul.f32.gmra.mxu0 %v390_v45  ;;  %549 = vmatmul.f32.gmra.mxu1 %v390_v45 }
  0xd9   : > { %487 = vmatmul.f32.gmra.mxu0 %v391_v46  ;;  %552 = vmatmul.f32.gmra.mxu1 %v391_v46 }
  0xe1   : > { %490 = vmatmul.f32.gmra.mxu0 %v392_v47  ;;  %555 = vmatmul.f32.gmra.mxu1 %v392_v47 }
  0xe9   : > { %493 = vmatmul.f32.gmra.mxu0 %v393_v48  ;;  %558 = vmatmul.f32.gmra.mxu1 %v393_v48 }
  0xee   : > { %v449_v58 = vpop.f32.mrf.mxu0  ;;  %v514_v59 = vpop.f32.mrf.mxu1 }
  0xef   : > { %v3015_v62 = vadd.f32 %v449_v58, %v3006_v54  ;;  %v3018_v63 = vadd.f32 %v514_v59, %v3008_v55 }
  0xf1   : > { %v3023_v2 = vmul.f32 0.70710677, %v3015_v62  ;;  %v3026_v3 = vmul.f32 0.70710677, %v3018_v63 }
  0xf3   : > { %v626_v4 = vmul.f32 %v3023_v2, %v3023_v2  ;;  %v666_v5 = vmul.f32 %v3026_v3, %v3026_v3 }
  0xf5   : > { %v3034_v8 = vmin.f32 %v626_v4, 16.0  ;;  %v3038_v13 = vmin.f32 %v666_v5, 16.0 }
  0xf6   : > { %v452_v11 = vpop.f32.mrf.mxu0  ;;  %v517_v12 = vpop.f32.mrf.mxu1 }
  0xf7   : > { %v3041_v14 = vadd.f32 %v452_v11, %v3006_v54  ;;  %v3044_v15 = vadd.f32 %v517_v12, %v3008_v55  ;;  %v639_v18 = vmul.f32 3.8918573e-05, %v3034_v8  ;;  %v628_v19 = vmul.f32 2.1237322e-06, %v3034_v8  ;;  %v1987_v11 = vld [vmem:[%s2962_s14 + $0x8] sm:$0xff] }
  0xf8   : > { %v668_v24 = vmul.f32 2.1237322e-06, %v3038_v13  ;;  %v2003_v12 = vld [vmem:[%s2962_s14 + $0x88] sm:$0xff]  ;;  %2032 = vmatpush.msra.mxu2 %v1987_v11 }
  0xf9   : > { %v3051_v20 = vmul.f32 0.70710677, %v3041_v14  ;;  %v3054_v21 = vmul.f32 0.70710677, %v3044_v15  ;;  %v640_v27 = vadd.f32 0.001143296, %v639_v18  ;;  %2097 = vmatpush.msra.mxu3 %v2003_v12 }
  0xfa   : > { %v629_v37 = vadd.f32 0.00028619796, %v628_v19  ;;  %v669_v38 = vadd.f32 0.00028619796, %v668_v24  ;;  %v1986_v24 = vld [vmem:[%s2962_s14] sm:$0xff] }
  0xfb   : > { %v706_v28 = vmul.f32 %v3051_v20, %v3051_v20  ;;  %v746_v29 = vmul.f32 %v3054_v21, %v3054_v21  ;;  %v641_v32 = vmul.f32 %v640_v27, %v3034_v8  ;;  %2033 = vmatpush.msra.mxu2 %v1986_v24  ;;  %2098 = vmatpush.msra.mxu3 %v2002_v25 }
  0xfc   : > { %v630_v47 = vmul.f32 %v629_v37, %v3034_v8  ;;  %v670_v48 = vmul.f32 %v669_v38, %v3038_v13 }
  0xfd   : > { %v3068_v33 = vmin.f32 %v706_v28, 16.0  ;;  %v3070_v34 = vmin.f32 %v746_v29, 16.0  ;;  %v642_v45 = vadd.f32 0.014752088, %v641_v32 }
  0xfe   : > { %v455_v35 = vpop.f32.mrf.mxu0  ;;  %v520_v36 = vpop.f32.mrf.mxu1  ;;  %v631_v1 = vadd.f32 0.0036580483, %v630_v47  ;;  %v671_v4 = vadd.f32 0.0036580483, %v670_v48 }
  0xff   : > { %v3073_v39 = vadd.f32 %v455_v35, %v3006_v54  ;;  %v3076_v40 = vadd.f32 %v520_v36, %v3008_v55  ;;  %v708_v43 = vmul.f32 2.1237322e-06, %v3068_v33  ;;  %v748_v44 = vmul.f32 2.1237322e-06, %v3070_v34 }
 0x100   : > { %v643_v58 = vmul.f32 %v642_v45, %v3034_v8  ;;  %v632_v19 = vmul.f32 %v631_v1, %v3034_v8  ;;  %v672_v22 = vmul.f32 %v671_v4, %v3038_v13 }
 0x101   : > { %v3083_v46 = vmul.f32 0.70710677, %v3073_v39  ;;  %v709_v49 = vadd.f32 0.00028619796, %v708_v43  ;;  %v3088_v50 = vmul.f32 0.70710677, %v3076_v40 }
 0x102   : > { %v749_v53 = vadd.f32 0.00028619796, %v748_v44  ;;  %v644_v18 = vadd.f32 0.112945676, %v643_v58  ;;  %v633_v37 = vadd.f32 0.05243302, %v632_v19 }
 0x103   : > { %v786_v56 = vmul.f32 %v3083_v46, %v3083_v46  ;;  %v826_v57 = vmul.f32 %v3088_v50, %v3088_v50  ;;  %v710_v5 = vmul.f32 %v709_v49, %v3068_v33  ;;  %v673_v38 = vadd.f32 0.05243302, %v672_v22 }
 0x104   : > { %v750_v7 = vmul.f32 %v749_v53, %v3070_v34  ;;  %v645_v31 = vmul.f32 %v644_v18, %v3034_v8  ;;  %v3144_v53 = vmul.f32 0.5, %v3015_v62  ;;  %v679_v58 = vmul.f32 3.8918573e-05, %v3038_v13 }
 0x105   : > { %v3097_v59 = vmin.f32 %v786_v56, 16.0  ;;  %v3103_v9 = vmin.f32 %v826_v57, 16.0  ;;  %v711_v23 = vadd.f32 0.0036580483, %v710_v5  ;;  %v3147_v56 = vmul.f32 0.5, %v3018_v63 }
 0x106   : > { %v458_v60 = vpop.f32.mrf.mxu0  ;;  %v523_v61 = vpop.f32.mrf.mxu1  ;;  %v751_v26 = vadd.f32 0.0036580483, %v750_v7  ;;  %v646_v52 = vadd.f32 0.4994258, %v645_v31  ;;  %v3159_v62 = vmul.f32 0.5, %v3041_v14 }
 0x107   : > { %v3106_v10 = vadd.f32 %v458_v60, %v3006_v54  ;;  %v788_v16 = vmul.f32 2.1237322e-06, %v3097_v59  ;;  %v3112_v17 = vadd.f32 %v523_v61, %v3008_v55  ;;  %v828_v27 = vmul.f32 2.1237322e-06, %v3103_v9 }
 0x108   : > { %v712_v43 = vmul.f32 %v711_v23, %v3068_v33  ;;  %v752_v44 = vmul.f32 %v751_v26, %v3070_v34  ;;  %v634_v60 = vmul.f32 %v633_v37, %v3034_v8  ;;  %v674_v61 = vmul.f32 %v673_v38, %v3038_v13 }
 0x109   : > { %v3120_v28 = vmul.f32 0.70710677, %v3106_v10  ;;  %v789_v29 = vadd.f32 0.00028619796, %v788_v16  ;;  %v3123_v30 = vmul.f32 0.70710677, %v3112_v17  ;;  %v647_v12 = vmul.f32 %v646_v52, %v3034_v8 }
 0x10a   : > { %v829_v45 = vadd.f32 0.00028619796, %v828_v27  ;;  %v713_v4 = vadd.f32 0.05243302, %v712_v43  ;;  %v753_v63 = vadd.f32 0.05243302, %v752_v44 }
 0x10b   : > { %v866_v32 = vmul.f32 %v3120_v28, %v3120_v28  ;;  %v906_v41 = vmul.f32 %v3123_v30, %v3123_v30  ;;  %v790_v48 = vmul.f32 %v789_v29, %v3097_v59  ;;  %v680_v22 = vadd.f32 0.001143296, %v679_v58 }
 0x10c   : > { %v830_v5 = vmul.f32 %v829_v45, %v3103_v9  ;;  %v635_v23 = vadd.f32 0.18741608, %v634_v60  ;;  %v675_v14 = vadd.f32 0.18741608, %v674_v61  ;;  %v714_v25 = vmul.f32 %v713_v4, %v3068_v33 }
 0x10d   : > { %v3135_v47 = vmin.f32 %v866_v32, 16.0  ;;  %v3138_v49 = vmin.f32 %v906_v41, 16.0  ;;  %v791_v6 = vadd.f32 0.0036580483, %v790_v48  ;;  %v754_v32 = vmul.f32 %v753_v63, %v3070_v34 }
 0x10e   : > { %v461_v35 = vpop.f32.mrf.mxu0  ;;  %v526_v36 = vpop.f32.mrf.mxu1  ;;  %v831_v26 = vadd.f32 0.0036580483, %v830_v5  ;;  %v3178_v37 = vadd.f32 1.0, %v647_v12  ;;  %v636_v45 = vmul.f32 %v635_v23, %v3034_v8  ;;  %v3188_v48 = vmul.f32 0.5, %v3044_v15 }
 0x10f   : > { %v3131_v42 = vadd.f32 %v461_v35, %v3006_v54  ;;  %v3150_v57 = vadd.f32 %v526_v36, %v3008_v55  ;;  %v868_v0 = vmul.f32 2.1237322e-06, %v3135_v47  ;;  %v908_v7 = vmul.f32 2.1237322e-06, %v3138_v49 }
 0x110   : > { %v792_v35 = vmul.f32 %v791_v6, %v3097_v59  ;;  %v681_v58 = vmul.f32 %v680_v22, %v3038_v13  ;;  %v715_v60 = vadd.f32 0.18741608, %v714_v25  ;;  %v832_v61 = vmul.f32 %v831_v26, %v3103_v9 }
 0x111   : > { %v3141_v51 = vmul.f32 0.70710677, %v3131_v42  ;;  %v869_v16 = vadd.f32 0.00028619796, %v868_v0  ;;  %v3167_v18 = vmul.f32 0.70710677, %v3150_v57  ;;  %v676_v4 = vmul.f32 %v675_v14, %v3038_v13 }
 0x112   : > { %v909_v36 = vadd.f32 0.00028619796, %v908_v7  ;;  %v755_v63 = vadd.f32 0.18741608, %v754_v32  ;;  %v793_v8 = vadd.f32 0.05243302, %v792_v35  ;;  %2516 = vrcp.f32 %v3178_v37 }
 0x113   : > { %v946_v1 = vmul.f32 %v3141_v51, %v3141_v51  ;;  %v986_v27 = vmul.f32 %v3167_v18, %v3167_v18  ;;  %v870_v38 = vmul.f32 %v869_v16, %v3135_v47  ;;  %v637_v16 = vadd.f32 1.1283791, %v636_v45 }
 0x114   : > { %v910_v15 = vmul.f32 %v909_v36, %v3138_v49  ;;  %v682_v22 = vadd.f32 0.014752088, %v681_v58  ;;  %v716_v23 = vmul.f32 %v715_v60, %v3068_v33  ;;  %v833_v14 = vadd.f32 0.05243302, %v832_v61 }
 0x115   : > { %v3163_v11 = vmin.f32 %v946_v1, 16.0  ;;  %v3181_v43 = vmin.f32 %v986_v27, 16.0  ;;  %v871_v5 = vadd.f32 0.0036580483, %v870_v38  ;;  %v677_v26 = vadd.f32 1.1283791, %v676_v4 }
 0x116   : > { %v464_v19 = vpop.f32.mrf.mxu0  ;;  %v529_v31 = vpop.f32.mrf.mxu1  ;;  %v756_v27 = vmul.f32 %v755_v63, %v3070_v34  ;;  %v3215_v35 = vmul.f32 0.5, %v3073_v39  ;;  %v911_v38 = vadd.f32 0.0036580483, %v910_v15  ;;  %v3219_v45 = vmul.f32 0.5, %v3076_v40 }
 0x117   : > { %v948_v24 = vmul.f32 2.1237322e-06, %v3163_v11  ;;  %v3174_v29 = vadd.f32 %v464_v19, %v3006_v54  ;;  %v3191_v52 = vadd.f32 %v529_v31, %v3008_v55  ;;  %v988_v0 = vmul.f32 2.1237322e-06, %v3181_v43 }
 0x118   : > { %v794_v31 = vmul.f32 %v793_v8, %v3097_v59  ;;  %v872_v36 = vmul.f32 %v871_v5, %v3135_v47  ;;  %v683_v61 = vmul.f32 %v682_v22, %v3038_v13  ;;  %v717_v4 = vadd.f32 1.1283791, %v716_v23 }
 0x119   : > { %v949_v41 = vadd.f32 0.00028619796, %v948_v24  ;;  %v3184_v44 = vmul.f32 0.70710677, %v3174_v29  ;;  %v3205_v19 = vmul.f32 0.70710677, %v3191_v52  ;;  %v834_v39 = vmul.f32 %v833_v14, %v3103_v9 }
 0x11a   : > { %v989_v24 = vadd.f32 0.00028619796, %v988_v0  ;;  %v2517_v0 = vpop.eup %2516  ;;  %v3228_v8 = vmul.f32 %v677_v26, %v3026_v3  ;;  %v757_v15 = vadd.f32 1.1283791, %v756_v27  ;;  %v795_v40 = vadd.f32 0.18741608, %v794_v31 }
 0x11b   : > { %v1026_v1 = vmul.f32 %v3184_v44, %v3184_v44  ;;  %v950_v6 = vmul.f32 %v949_v41, %v3163_v11  ;;  %v1066_v60 = vmul.f32 %v3205_v19, %v3205_v19  ;;  %v3240_v23 = vmul.f32 0.5, %v3112_v17 }
 0x11c   : > { %v990_v63 = vmul.f32 %v989_v24, %v3181_v43  ;;  %v3246_v24 = vmul.f32 %v717_v4, %v3051_v20  ;;  %v3249_v26 = vmul.f32 0.5, %v3131_v42  ;;  %v3252_v31 = vmul.f32 %v757_v15, %v3054_v21 }
 0x11d   : > { %v3201_v7 = vmin.f32 %v1026_v1, 16.0  ;;  %v951_v41 = vadd.f32 0.0036580483, %v950_v6  ;;  %v638_v1 = vmul.f32 %v637_v16, %v3023_v2  ;;  %v873_v6 = vadd.f32 0.05243302, %v872_v36  ;;  %4330 = vst [vmem:[#allocation20_spill] sm:$0xff] %v3240_v23 }
 0x11e   : > { %v467_v12 = vpop.f32.mrf.mxu0  ;;  %v650_v2 = vmul.f32 %v2517_v0, %v3178_v37  ;;  %v3237_v16 = vmul.f32 0.5, %v3106_v10  ;;  %v3243_v14 = vmin.f32 %v1066_v60, 16.0  ;;  %4331 = vst [vmem:[#allocation21_spill] sm:$0xff] %v3249_v26  ;;  %v991_v27 = vadd.f32 0.0036580483, %v990_v63  ;;  %v532_v36 = vpop.f32.mrf.mxu1 }
 0x11f   : > { %v1028_v25 = vmul.f32 2.1237322e-06, %v3201_v7  ;;  %v3212_v32 = vadd.f32 %v467_v12, %v3006_v54  ;;  %v912_v12 = vmul.f32 %v911_v38, %v3138_v49  ;;  %v952_v22 = vmul.f32 %v951_v41, %v3163_v11 }
 0x120   : > { %v3255_v10 = vmul.f32 0.5, %v3150_v57  ;;  %v651_v38 = vsub.f32 1.0, %v650_v2  ;;  %v796_v41 = vmul.f32 %v795_v40, %v3097_v59  ;;  %v874_v20 = vmul.f32 %v873_v6, %v3135_v47 }
 0x121   : > { %v1029_v58 = vadd.f32 0.00028619796, %v1028_v25  ;;  %v3231_v5 = vmul.f32 0.70710677, %v3212_v32  ;;  %v835_v25 = vadd.f32 0.18741608, %v834_v39  ;;  %vm655_vm0 = vweird.f32 %v2517_v0 }
 0x122   : > { %4332 = vst [vmem:[#allocation22_spill] sm:$0xff] %v3255_v10  ;;  %v953_v60 = vadd.f32 0.05243302, %v952_v22  ;;  %v1068_v4 = vmul.f32 2.1237322e-06, %v3243_v14  ;;  %v652_v39 = vmul.f32 %v2517_v0, %v651_v38  ;;  %v992_v57 = vmul.f32 %v991_v27, %v3181_v43 }
 0x123   : > { %v1030_v3 = vmul.f32 %v1029_v58, %v3201_v7  ;;  %v1106_v17 = vmul.f32 %v3231_v5, %v3231_v5  ;;  %v913_v58 = vadd.f32 0.05243302, %v912_v12  ;;  %v836_v21 = vmul.f32 %v835_v25, %v3103_v9 }
 0x124   : > { %v3265_v63 = vadd.f32 %v532_v36, %v3008_v55  ;;  %v658_v15 = vand.u32 2147483647, %v3178_v37  ;;  %v653_v40 = vadd.f32 %v2517_v0, %v652_v39  ;;  %vm654_vm1 = vweird.f32 %v3178_v37 }
 0x125   : > { %v1031_v42 = vadd.f32 0.0036580483, %v1030_v3  ;;  %v3268_v2 = vmin.f32 %v1106_v17, 16.0  ;;  %v660_v6 = vand.u32 2147483648, %v3178_v37  ;;  %v797_v12 = vadd.f32 1.1283791, %v796_v41  ;;  %vm656_vm2 = vmor %vm654_vm1, %vm655_vm0 }
 0x126   : > { %v875_v22 = vadd.f32 0.18741608, %v874_v20  ;;  %v914_v3 = vmul.f32 %v913_v58, %v3138_v49  ;;  %v954_v25 = vmul.f32 %v953_v60, %v3163_v11  ;;  %v1069_v36 = vadd.f32 0.00028619796, %v1068_v4 }
 0x127   : > { %v1032_v27 = vmul.f32 %v1031_v42, %v3201_v7  ;;  %v657_v38 = vsel %vm656_vm2, %v2517_v0, %v653_v40  ;;  %v661_v10 = vor.u32 1.1754944e-38, %v660_v6  ;;  %v993_v26 = vadd.f32 0.05243302, %v992_v57 }
 0x128   : > { %v3276_v17 = vmul.f32 0.5, %v3174_v29  ;;  %vm659_vm3 = vcmp.eq.f32.partialorder %v658_v15, 8.507059e+37  ;;  %v684_v39 = vadd.f32 0.112945676, %v683_v61  ;;  %v1108_v37 = vmul.f32 2.1237322e-06, %v3268_v2  ;;  %v470_v61 = vpop.f32.mrf.mxu0 }
 0x129   : > { %v3280_v41 = vmul.f32 0.70710677, %v3265_v63  ;;  %v662_v20 = vsel %vm659_vm3, %v661_v10, %v657_v38  ;;  %v719_v58 = vmul.f32 3.8918573e-05, %v3068_v33  ;;  %v837_v60 = vadd.f32 1.1283791, %v836_v21 }
 0x12a   : > { %4333 = vst [vmem:[#allocation23_spill] sm:$0xff] %v3276_v17  ;;  %v915_v23 = vadd.f32 0.18741608, %v914_v3  ;;  %v663_v42 = vmul.f32 %v662_v20, %v638_v1  ;;  %v685_v0 = vmul.f32 %v684_v39, %v3038_v13  ;;  %v876_v4 = vmul.f32 %v875_v22, %v3135_v47 }
 0x12b   : > { %v955_v57 = vadd.f32 0.18741608, %v954_v25  ;;  %v1033_v29 = vadd.f32 0.05243302, %v1032_v27  ;;  %v1070_v15 = vmul.f32 %v1069_v36, %v3243_v14  ;;  %v3287_v40 = vmul.f32 %v797_v12, %v3083_v46 }
 0x12c   : > { %v2386_v6 = vclamps-f32 %v663_v42, 1.0  ;;  %v686_v17 = vadd.f32 0.4994258, %v685_v0  ;;  %v720_v10 = vadd.f32 0.001143296, %v719_v58  ;;  %v994_v38 = vmul.f32 %v993_v26, %v3181_v43 }
 0x12d   : > { %v1109_v21 = vadd.f32 0.00028619796, %v1108_v37  ;;  %v1146_v1 = vmul.f32 %v3280_v41, %v3280_v41  ;;  %v3293_v3 = vadd.f32 %v470_v61, %v3006_v54  ;;  %v916_v22 = vmul.f32 %v915_v23, %v3138_v49  ;;  %v535_v37 = vpop.f32.mrf.mxu1 }
 0x12e   : > { %v3297_v25 = vmul.f32 0.5, %v3191_v52  ;;  %v1906_v27 = vadd.f32 1.0, %v2386_v6  ;;  %v687_v46 = vmul.f32 %v686_v17, %v3038_v13  ;;  %v877_v12 = vadd.f32 1.1283791, %v876_v4 }
 0x12f   : > { %v956_v36 = vmul.f32 %v955_v57, %v3163_v11  ;;  %v1034_v26 = vmul.f32 %v1033_v29, %v3201_v7  ;;  %v1071_v39 = vadd.f32 0.0036580483, %v1070_v15  ;;  %v721_v42 = vmul.f32 %v720_v10, %v3068_v33 }
 0x130   : > { %4334 = vst [vmem:[#allocation24_spill] sm:$0xff] %v3297_v25  ;;  %v1938_v20 = vmul.f32 %v1906_v27, %v3144_v53  ;;  %v3303_v58 = vadd.f32 1.0, %v687_v46  ;;  %v759_v23 = vmul.f32 3.8918573e-05, %v3070_v34  ;;  %v995_v52 = vadd.f32 0.18741608, %v994_v38 }
 0x131   : > { %v1110_v0 = vmul.f32 %v1109_v21, %v3268_v2  ;;  %v3308_v61 = vmin.f32 %v1146_v1, 16.0  ;;  %v3311_v13 = vmul.f32 0.70710677, %v3293_v3  ;;  %v3314_v17 = vmul.f32 %v837_v60, %v3088_v50 }
 0x132   : > { %v3317_v4 = vmul.f32 0.5, %v3212_v32  ;;  %2034 = vmatmul.f32.vlgmr.msra.gmra.mxu2 %v1938_v20  ;;  %2518 = vrcp.f32 %v3303_v58  ;;  %v3321_v53 = vadd.f32 %v535_v37, %v3008_v55  ;;  %v917_v57 = vadd.f32 1.1283791, %v916_v22 }
 0x133   : > { %v1035_v29 = vadd.f32 0.18741608, %v1034_v26  ;;  %v1072_v15 = vmul.f32 %v1071_v39, %v3243_v14  ;;  %v3325_v6 = vmul.f32 0.5, %v3265_v63  ;;  %v3328_v10 = vmul.f32 %v877_v12, %v3120_v28 }
 0x134   : > { %4335 = vst [vmem:[#allocation25_spill] sm:$0xff] %v3317_v4  ;;  %v957_v50 = vadd.f32 1.1283791, %v956_v36  ;;  %v722_v60 = vadd.f32 0.014752088, %v721_v42  ;;  %v996_v38 = vmul.f32 %v995_v52, %v3181_v43  ;;  %v1186_v22 = vmul.f32 %v3311_v13, %v3311_v13 }
 0x135   : > { %4336 = vst [vmem:[#allocation26_spill] sm:$0xff] %v3325_v6  ;;  %v760_v32 = vadd.f32 0.001143296, %v759_v23  ;;  %v1111_v21 = vadd.f32 0.0036580483, %v1110_v0  ;;  %v3341_v12 = vmul.f32 %v917_v57, %v3123_v30  ;;  %v1036_v36 = vmul.f32 %v1035_v29, %v3201_v7 }
 0x136   : > { %v1148_v1 = vmul.f32 2.1237322e-06, %v3308_v61  ;;  %v3335_v27 = vmul.f32 0.70710677, %v3321_v53  ;;  %v723_v63 = vmul.f32 %v722_v60, %v3068_v33  ;;  %v799_v28 = vmul.f32 3.8918573e-05, %v3097_v59 }
 0x137   : > { %v761_v46 = vmul.f32 %v760_v32, %v3070_v34  ;;  %v1073_v26 = vadd.f32 0.05243302, %v1072_v15  ;;  %v839_v39 = vmul.f32 3.8918573e-05, %v3103_v9  ;;  %v3346_v20 = vmul.f32 %v957_v50, %v3141_v51 }
 0x138   : > { %4337 = vst [vmem:[#allocation27_spill] sm:$0xff] %v3335_v27  ;;  %v2519_v37 = vpop.eup %2518  ;;  %v724_v42 = vadd.f32 0.112945676, %v723_v63  ;;  %v800_v52 = vadd.f32 0.001143296, %v799_v28  ;;  %v1112_v60 = vmul.f32 %v1111_v21, %v3268_v2  ;;  %v3350_v30 = vmin.f32 %v1186_v22, 16.0 }
 0x139   : > { %4338 = vst [vmem:[#allocation28_spill] sm:$0xff] %v3346_v20  ;;  %v762_v23 = vadd.f32 0.014752088, %v761_v46  ;;  %v997_v0 = vadd.f32 1.1283791, %v996_v38  ;;  %v690_v6 = vmul.f32 %v2519_v37, %v3303_v58  ;;  %v1226_v57 = vmul.f32 %v3335_v27, %v3335_v27 }
 0x13a   : > { %v1149_v32 = vadd.f32 0.00028619796, %v1148_v1  ;;  %v725_v29 = vmul.f32 %v724_v42, %v3068_v33  ;;  %v1037_v51 = vadd.f32 1.1283791, %v1036_v36  ;;  %v801_v63 = vmul.f32 %v800_v52, %v3097_v59 }
 0x13b   : > { %v763_v15 = vmul.f32 %v762_v23, %v3070_v34  ;;  %v691_v50 = vsub.f32 1.0, %v690_v6  ;;  %v840_v46 = vadd.f32 0.001143296, %v839_v39  ;;  %v1074_v38 = vmul.f32 %v1073_v26, %v3243_v14 }
 0x13c   : > { %v700_v21 = vand.u32 2147483648, %v3303_v58  ;;  %v726_v1 = vadd.f32 0.4994258, %v725_v29  ;;  %v1113_v22 = vadd.f32 0.05243302, %v1112_v60  ;;  %vm695_vm4 = vweird.f32 %v2519_v37 }
 0x13d   : > { %v764_v28 = vadd.f32 0.112945676, %v763_v15  ;;  %v692_v4 = vmul.f32 %v2519_v37, %v691_v50  ;;  %v698_v25 = vand.u32 2147483647, %v3303_v58  ;;  %v1188_v42 = vmul.f32 2.1237322e-06, %v3350_v30 }
 0x13e   : > { %v3361_v20 = vmin.f32 %v1226_v57, 16.0  ;;  %v727_v6 = vmul.f32 %v726_v1, %v3068_v33  ;;  %vm694_vm5 = vweird.f32 %v3303_v58  ;;  %v802_v26 = vadd.f32 0.014752088, %v801_v63  ;;  %v473_v33 = vpop.f32.mrf.mxu0  ;;  %v538_v63 = vpop.f32.mrf.mxu1 }
 0x13f   : > { %v765_v36 = vmul.f32 %v764_v28, %v3070_v34  ;;  %v693_v39 = vadd.f32 %v2519_v37, %v692_v4  ;;  %v841_v23 = vmul.f32 %v840_v46, %v3103_v9  ;;  %vm696_vm6 = vmor %vm694_vm5, %vm695_vm4  ;;  %v701_v52 = vor.u32 1.1754944e-38, %v700_v21 }
 0x140   : > { %v3367_v60 = vadd.f32 1.0, %v727_v6  ;;  %v879_v15 = vmul.f32 3.8918573e-05, %v3135_v47  ;;  %v1075_v50 = vadd.f32 0.18741608, %v1074_v38  ;;  %v1150_v57 = vmul.f32 %v1149_v32, %v3308_v61 }
 0x141   : > { %v766_v29 = vadd.f32 0.4994258, %v765_v36  ;;  %v697_v27 = vsel %vm696_vm6, %v2519_v37, %v693_v39  ;;  %vm699_vm7 = vcmp.eq.f32.partialorder %v698_v25, 8.507059e+37  ;;  %v1189_v4 = vadd.f32 0.00028619796, %v1188_v42 }
 0x142   : > { %v702_v1 = vsel %vm699_vm7, %v701_v52, %v697_v27  ;;  %v1228_v58 = vmul.f32 2.1237322e-06, %v3361_v20  ;;  %2520 = vrcp.f32 %v3367_v60  ;;  %v1114_v46 = vmul.f32 %v1113_v22, %v3268_v2 }
 0x143   : > { %v703_v21 = vmul.f32 %v702_v1, %v3228_v8  ;;  %v803_v28 = vmul.f32 %v802_v26, %v3097_v59  ;;  %v842_v6 = vadd.f32 0.014752088, %v841_v23  ;;  %v767_v38 = vmul.f32 %v766_v29, %v3070_v34 }
 0x144   : > { %v3378_v37 = vadd.f32 %v473_v33, %v3006_v54  ;;  %v3381_v25 = vadd.f32 %v538_v63, %v3008_v55  ;;  %v880_v27 = vadd.f32 0.001143296, %v879_v15  ;;  %v3384_v32 = vmul.f32 %v997_v0, %v3167_v18 }
 0x145   : > { %v1076_v42 = vmul.f32 %v1075_v50, %v3243_v14  ;;  %v1151_v22 = vadd.f32 0.0036580483, %v1150_v57  ;;  %v2387_v36 = vclamps-f32 %v703_v21, 1.0  ;;  %v1190_v8 = vmul.f32 %v1189_v4, %v3350_v30 }
 0x146   : > { %v1229_v39 = vadd.f32 0.00028619796, %v1228_v58  ;;  %v3388_v26 = vadd.f32 1.0, %v767_v38  ;;  %v3391_v34 = vmul.f32 0.70710677, %v3378_v37  ;;  %v3394_v23 = vmul.f32 %v1037_v51, %v3184_v44 }
 0x147   : > { %v1907_v52 = vadd.f32 1.0, %v2387_v36  ;;  %v804_v29 = vadd.f32 0.112945676, %v803_v28  ;;  %v843_v18 = vmul.f32 %v842_v6, %v3103_v9  ;;  %v1115_v15 = vadd.f32 0.18741608, %v1114_v46 }
 0x148   : > { %v2521_v0 = vpop.eup %2520  ;;  %2522 = vrcp.f32 %v3388_v26  ;;  %v3399_v50 = vmul.f32 0.70710677, %v3381_v25  ;;  %v881_v57 = vmul.f32 %v880_v27, %v3135_v47  ;;  %v3402_v33 = vadd.f32 1.1283791, %v1076_v42 }
 0x149   : > { %v1152_v1 = vmul.f32 %v1151_v22, %v3308_v61  ;;  %v1939_v44 = vmul.f32 %v1907_v52, %v3147_v56  ;;  %v730_v51 = vmul.f32 %v2521_v0, %v3367_v60  ;;  %v3408_v4 = vmul.f32 0.5, %v3293_v3 }
 0x14a   : > { %v1191_v58 = vadd.f32 0.0036580483, %v1190_v8  ;;  %v1230_v63 = vmul.f32 %v1229_v39, %v3361_v20  ;;  %v1266_v46 = vmul.f32 %v3391_v34, %v3391_v34  ;;  %v738_v28 = vand.u32 2147483647, %v3367_v60 }
 0x14b   : > { %4339 = vst [vmem:[#allocation29_spill] sm:$0xff] %v3408_v4  ;;  %2099 = vmatmul.f32.vlgmr.msra.gmra.mxu3 %v1939_v44  ;;  %v731_v21 = vsub.f32 1.0, %v730_v51  ;;  %v805_v6 = vmul.f32 %v804_v29, %v3097_v59  ;;  %v844_v38 = vadd.f32 0.112945676, %v843_v18  ;;  %v1116_v56 = vmul.f32 %v1115_v15, %v3268_v2 }
 0x14c   : > { %v740_v27 = vand.u32 2147483648, %v3367_v60  ;;  %v1306_v3 = vmul.f32 %v3399_v50, %v3399_v50  ;;  %v882_v42 = vadd.f32 0.014752088, %v881_v57  ;;  %vm735_vm8 = vweird.f32 %v2521_v0 }
 0x14d   : > { %v732_v22 = vmul.f32 %v2521_v0, %v731_v21  ;;  %v806_v36 = vadd.f32 0.4994258, %v805_v6  ;;  %v845_v8 = vmul.f32 %v844_v38, %v3103_v9  ;;  %v1153_v52 = vadd.f32 0.05243302, %v1152_v1 }
 0x14e   : > { %v2523_v39 = vpop.eup %2522  ;;  %v1192_v44 = vmul.f32 %v1191_v58, %v3350_v30  ;;  %v1231_v51 = vadd.f32 0.0036580483, %v1230_v63  ;;  %v3421_v29 = vmin.f32 %v1266_v46, 16.0  ;;  %vm734_vm9 = vweird.f32 %v3367_v60 }
 0x14f   : > { %v733_v18 = vadd.f32 %v2521_v0, %v732_v22  ;;  %vm739_vm10 = vcmp.eq.f32.partialorder %v738_v28, 8.507059e+37  ;;  %v770_v15 = vmul.f32 %v2523_v39, %v3388_v26  ;;  %vm736_vm11 = vmor %vm734_vm9, %vm735_vm8  ;;  %v741_v57 = vor.u32 1.1754944e-38, %v740_v27 }
 0x150   : > { %v3425_v21 = vmin.f32 %v1306_v3, 16.0  ;;  %v807_v6 = vmul.f32 %v806_v36, %v3097_v59  ;;  %v846_v38 = vadd.f32 0.4994258, %v845_v8  ;;  %v780_v58 = vand.u32 2147483648, %v3388_v26 }
 0x151   : > { %v737_v4 = vsel %vm736_vm11, %v2521_v0, %v733_v18  ;;  %v771_v1 = vsub.f32 1.0, %v770_v15  ;;  %v883_v63 = vmul.f32 %v882_v42, %v3135_v47  ;;  %v1268_v22 = vmul.f32 2.1237322e-06, %v3421_v29 }
 0x152   : > { %v742_v46 = vsel %vm739_vm10, %v741_v57, %v737_v4  ;;  %v3431_v60 = vadd.f32 1.0, %v807_v6  ;;  %v847_v28 = vmul.f32 %v846_v38, %v3103_v9  ;;  %vm775_vm12 = vweird.f32 %v2523_v39 }
 0x153   : > { %v743_v27 = vmul.f32 %v742_v46, %v3246_v24  ;;  %v772_v3 = vmul.f32 %v2523_v39, %v771_v1  ;;  %v778_v59 = vand.u32 2147483647, %v3388_v26  ;;  %v1154_v0 = vmul.f32 %v1153_v52, %v3308_v61 }
 0x154   : > { %v1193_v36 = vadd.f32 0.05243302, %v1192_v44  ;;  %v1308_v8 = vmul.f32 2.1237322e-06, %v3425_v21  ;;  %2524 = vrcp.f32 %v3431_v60  ;;  %v1232_v4 = vmul.f32 %v1231_v51, %v3361_v20 }
 0x155   : > { %v2388_v42 = vclamps-f32 %v743_v27, 1.0  ;;  %v773_v18 = vadd.f32 %v2523_v39, %v772_v3  ;;  %vm774_vm13 = vweird.f32 %v3388_v26  ;;  %v781_v9 = vor.u32 1.1754944e-38, %v780_v58 }
 0x156   : > { %vm776_vm14 = vmor %vm774_vm13, %vm775_vm12  ;;  %v1269_v24 = vadd.f32 0.00028619796, %v1268_v22  ;;  %v3441_v15 = vadd.f32 1.0, %v847_v28  ;;  %v884_v57 = vadd.f32 0.112945676, %v883_v63  ;;  %vm779_vm15 = vcmp.eq.f32.partialorder %v778_v59, 8.507059e+37  ;;  %v476_v63 = vpop.f32.mrf.mxu0 }
 0x157   : > { %v1117_v6 = vadd.f32 1.1283791, %v1116_v56  ;;  %v1908_v38 = vadd.f32 1.0, %v2388_v42  ;;  %v777_v52 = vsel %vm776_vm14, %v2523_v39, %v773_v18  ;;  %v1155_v44 = vadd.f32 0.18741608, %v1154_v0 }
 0x158   : > { %v782_v1 = vsel %vm779_vm15, %v781_v9, %v777_v52  ;;  %v1309_v46 = vadd.f32 0.00028619796, %v1308_v8  ;;  %2526 = vrcp.f32 %v3441_v15  ;;  %v3446_v51 = vmul.f32 %v3402_v33, %v3205_v19 }
 0x159   : > { %v1194_v26 = vmul.f32 %v1193_v36, %v3350_v30  ;;  %v1940_v58 = vmul.f32 %v1908_v38, %v3159_v62  ;;  %v783_v22 = vmul.f32 %v782_v1, %v3252_v31  ;;  %v1233_v28 = vadd.f32 0.05243302, %v1232_v4  ;;  %v541_v1 = vpop.f32.mrf.mxu1 }
 0x15a   : > { %v2525_v56 = vpop.eup %2524  ;;  %v1270_v39 = vmul.f32 %v1269_v24, %v3421_v29  ;;  %v885_v27 = vmul.f32 %v884_v57, %v3135_v47  ;;  %v919_v3 = vmul.f32 3.8918573e-05, %v3138_v49  ;;  %v3455_v59 = vmul.f32 %v1117_v6, %v3231_v5 }
 0x15b   : > { %v3458_v19 = vmul.f32 0.5, %v3321_v53  ;;  %2037 = vmatmul.f32.gmra.mxu2 %v1940_v58  ;;  %v2389_v33 = vclamps-f32 %v783_v22, 1.0  ;;  %v810_v62 = vmul.f32 %v2525_v56, %v3431_v60  ;;  %v1156_v31 = vmul.f32 %v1155_v44, %v3308_v61 }
 0x15c   : > { %v1310_v0 = vmul.f32 %v1309_v46, %v3425_v21  ;;  %v818_v36 = vand.u32 2147483647, %v3431_v60  ;;  %v3465_v8 = vadd.f32 %v476_v63, %v3006_v54  ;;  %v1195_v4 = vadd.f32 0.18741608, %v1194_v26 }
 0x15d   : > { %v1909_v42 = vadd.f32 1.0, %v2389_v33  ;;  %v811_v5 = vsub.f32 1.0, %v810_v62  ;;  %v820_v18 = vand.u32 2147483648, %v3431_v60  ;;  %v1234_v9 = vmul.f32 %v1233_v28, %v3361_v20 }
 0x15e   : > { %v2527_v53 = vpop.eup %2526  ;;  %v1271_v24 = vadd.f32 0.0036580483, %v1270_v39  ;;  %v886_v57 = vadd.f32 0.4994258, %v885_v27  ;;  %v920_v6 = vadd.f32 0.001143296, %v919_v3  ;;  %vm815_vm0 = vweird.f32 %v2525_v56 }
 0x15f   : > { %v1941_v38 = vmul.f32 %v1909_v42, %v3188_v48  ;;  %v812_v52 = vmul.f32 %v2525_v56, %v811_v5  ;;  %v850_v44 = vmul.f32 %v2527_v53, %v3441_v15  ;;  %v1311_v46 = vadd.f32 0.0036580483, %v1310_v0 }
 0x160   : > { %vm814_vm1 = vweird.f32 %v3431_v60  ;;  %vm3472_vm2 = vcmp.eq.f32.partialorder %v818_v36, 8.507059e+37  ;;  %v3477_v58 = vmul.f32 0.70710677, %v3465_v8  ;;  %v821_v63 = vor.u32 1.1754944e-38, %v820_v18 }
 0x161   : > { %2102 = vmatmul.f32.gmra.mxu3 %v1941_v38  ;;  %v813_v22 = vadd.f32 %v2525_v56, %v812_v52  ;;  %v851_v28 = vsub.f32 1.0, %v850_v44  ;;  %v887_v48 = vmul.f32 %v886_v57, %v3135_v47  ;;  %vm816_vm3 = vmor %vm814_vm1, %vm815_vm0  ;;  %v858_v39 = vand.u32 2147483647, %v3441_v15 }
 0x162   : > { %v860_v27 = vand.u32 2147483648, %v3441_v15  ;;  %v3483_v60 = vadd.f32 %v541_v1, %v3008_v55  ;;  %v921_v3 = vmul.f32 %v920_v6, %v3138_v49  ;;  %vm855_vm4 = vweird.f32 %v2527_v53 }
 0x163   : > { %v817_v33 = vsel %vm816_vm3, %v2525_v56, %v813_v22  ;;  %v852_v62 = vmul.f32 %v2527_v53, %v851_v28  ;;  %v3486_v0 = vadd.f32 1.0, %v887_v48  ;;  %v1272_v36 = vmul.f32 %v1271_v24, %v3421_v29 }
 0x164   : > { %v822_v47 = vsel %vm3472_vm2, %v821_v63, %v817_v33  ;;  %v1346_v42 = vmul.f32 %v3477_v58, %v3477_v58  ;;  %v922_v5 = vadd.f32 0.014752088, %v921_v3  ;;  %vm854_vm5 = vweird.f32 %v3441_v15 }
 0x165   : > { %v823_v18 = vmul.f32 %v822_v47, %v3287_v40  ;;  %v853_v57 = vadd.f32 %v2527_v53, %v852_v62  ;;  %2528 = vrcp.f32 %v3486_v0  ;;  %v1235_v56 = vadd.f32 0.18741608, %v1234_v9  ;;  %vm856_vm6 = vmor %vm854_vm5, %vm855_vm4 }
 0x166   : > { %v861_v6 = vor.u32 1.1754944e-38, %v860_v27  ;;  %v3497_v38 = vmul.f32 0.70710677, %v3483_v60  ;;  %v923_v24 = vmul.f32 %v922_v5, %v3138_v49  ;;  %vm859_vm7 = vcmp.eq.f32.partialorder %v858_v39, 8.507059e+37  ;;  %v544_v5 = vpop.f32.mrf.mxu1 }
 0x167   : > { %v2390_v52 = vclamps-f32 %v823_v18, 1.0  ;;  %v857_v44 = vsel %vm856_vm6, %v2527_v53, %v853_v57  ;;  %v959_v1 = vmul.f32 3.8918573e-05, %v3163_v11  ;;  %v1273_v26 = vadd.f32 0.05243302, %v1272_v36 }
 0x168   : > { %v1312_v40 = vmul.f32 %v1311_v46, %v3425_v21  ;;  %v862_v22 = vsel %vm859_vm7, %v861_v6, %v857_v44  ;;  %v3502_v15 = vmin.f32 %v1346_v42, 16.0  ;;  %v3504_v63 = vadd.f32 1.1283791, %v1156_v31  ;;  %v479_v42 = vpop.f32.mrf.mxu0 }
 0x169   : > { %v1910_v9 = vadd.f32 1.0, %v2390_v52  ;;  %v863_v28 = vmul.f32 %v862_v22, %v3314_v17  ;;  %v924_v48 = vadd.f32 0.112945676, %v923_v24  ;;  %v1196_v27 = vmul.f32 %v1195_v4, %v3350_v30 }
 0x16a   : > { %v3509_v3 = vmul.f32 0.5, %v3378_v37  ;;  %v1386_v53 = vmul.f32 %v3497_v38, %v3497_v38  ;;  %v960_v39 = vadd.f32 0.001143296, %v959_v1  ;;  %v1236_v46 = vmul.f32 %v1235_v56, %v3361_v20 }
 0x16b   : > { %v2529_v33 = vpop.eup %2528  ;;  %v1942_v62 = vmul.f32 %v1910_v9, %v3215_v35  ;;  %v2391_v31 = vclamps-f32 %v863_v28, 1.0  ;;  %v925_v36 = vmul.f32 %v924_v48, %v3138_v49  ;;  %v1274_v17 = vmul.f32 %v1273_v26, %v3421_v29 }
 0x16c   : > { %4342 = vst [vmem:[#allocation30_spill] sm:$0xff] %v3509_v3  ;;  %v1313_v47 = vadd.f32 0.05243302, %v1312_v40  ;;  %v1348_v4 = vmul.f32 2.1237322e-06, %v3502_v15  ;;  %v890_v37 = vmul.f32 %v2529_v33, %v3486_v0  ;;  %v3520_v6 = vadd.f32 %v479_v42, %v3006_v54 }
 0x16d   : > { %2040 = vmatmul.f32.gmra.mxu2 %v1942_v62  ;;  %v1911_v18 = vadd.f32 1.0, %v2391_v31  ;;  %v926_v57 = vadd.f32 0.4994258, %v925_v36  ;;  %v3523_v35 = vadd.f32 %v544_v5, %v3008_v55  ;;  %v3525_v56 = vmin.f32 %v1386_v53, 16.0 }
 0x16e   : > { %v891_v24 = vsub.f32 1.0, %v890_v37  ;;  %v900_v52 = vand.u32 2147483648, %v3486_v0  ;;  %v961_v44 = vmul.f32 %v960_v39, %v3163_v11  ;;  %v3532_v40 = vmul.f32 0.70710677, %v3520_v6 }
 0x16f   : > { %v1943_v1 = vmul.f32 %v1911_v18, %v3219_v45  ;;  %v927_v26 = vmul.f32 %v926_v57, %v3138_v49  ;;  %v999_v22 = vmul.f32 3.8918573e-05, %v3181_v43  ;;  %v1314_v9 = vmul.f32 %v1313_v47, %v3425_v21 }
 0x170   : > { %v892_v28 = vmul.f32 %v2529_v33, %v891_v24  ;;  %vm895_vm8 = vweird.f32 %v2529_v33  ;;  %v898_v48 = vand.u32 2147483647, %v3486_v0  ;;  %v1349_v53 = vadd.f32 0.00028619796, %v1348_v4 }
 0x171   : > { %2105 = vmatmul.f32.gmra.mxu3 %v1943_v1  ;;  %v3537_v62 = vadd.f32 1.0, %v927_v26  ;;  %v1426_v45 = vmul.f32 %v3532_v40, %v3532_v40  ;;  %v3542_v49 = vmul.f32 0.70710677, %v3523_v35  ;;  %v1388_v39 = vmul.f32 2.1237322e-06, %v3525_v56 }
 0x172   : > { %v893_v31 = vadd.f32 %v2529_v33, %v892_v28  ;;  %vm894_vm9 = vweird.f32 %v3486_v0  ;;  %v962_v36 = vadd.f32 0.014752088, %v961_v44  ;;  %v3546_v47 = vadd.f32 1.1283791, %v1196_v27 }
 0x173   : > { %vm896_vm10 = vmor %vm894_vm9, %vm895_vm8  ;;  %v901_v37 = vor.u32 1.1754944e-38, %v900_v52  ;;  %2530 = vrcp.f32 %v3537_v62  ;;  %v1000_v4 = vadd.f32 0.001143296, %v999_v22  ;;  %v3549_v42 = vadd.f32 1.1283791, %v1236_v46 }
 0x174   : > { %v897_v5 = vsel %vm896_vm10, %v2529_v33, %v893_v31  ;;  %vm899_vm11 = vcmp.eq.f32.partialorder %v898_v48, 8.507059e+37  ;;  %v3551_v18 = vmin.f32 %v1426_v45, 16.0  ;;  %v1275_v57 = vadd.f32 0.18741608, %v1274_v17 }
 0x175   : > { %v1350_v24 = vmul.f32 %v1349_v53, %v3502_v15  ;;  %v902_v1 = vsel %vm899_vm11, %v901_v37, %v897_v5  ;;  %v1466_v0 = vmul.f32 %v3542_v49, %v3542_v49  ;;  %v1315_v27 = vadd.f32 0.18741608, %v1314_v9 }
 0x176   : > { %v1389_v44 = vadd.f32 0.00028619796, %v1388_v39  ;;  %v903_v52 = vmul.f32 %v902_v1, %v3328_v10  ;;  %v963_v26 = vmul.f32 %v962_v36, %v3163_v11  ;;  %v1428_v46 = vmul.f32 2.1237322e-06, %v3551_v18 }
 0x177   : > { %v3559_v22 = vmin.f32 %v1466_v0, 16.0  ;;  %v1001_v33 = vmul.f32 %v1000_v4, %v3181_v43  ;;  %v1039_v17 = vmul.f32 3.8918573e-05, %v3201_v7  ;;  %v3564_v28 = vmul.f32 0.5, %v3381_v25 }
 0x178   : > { %v2392_v48 = vclamps-f32 %v903_v52, 1.0  ;;  %v964_v53 = vadd.f32 0.112945676, %v963_v26  ;;  %v1079_v9 = vmul.f32 3.8918573e-05, %v3243_v14  ;;  %v3569_v10 = vmul.f32 %v3504_v63, %v3280_v41 }
 0x179   : > { %4343 = vst [vmem:[#allocation31_spill] sm:$0xff] %v3564_v28  ;;  %v2531_v45 = vpop.eup %2530  ;;  %v1351_v39 = vadd.f32 0.0036580483, %v1350_v24  ;;  %v1002_v31 = vadd.f32 0.014752088, %v1001_v33  ;;  %v1276_v37 = vmul.f32 %v1275_v57, %v3421_v29  ;;  %v1390_v4 = vmul.f32 %v1389_v44, %v3525_v56 }
 0x17a   : > { %v1040_v36 = vadd.f32 0.001143296, %v1039_v17  ;;  %v1912_v5 = vadd.f32 1.0, %v2392_v48  ;;  %v930_v25 = vmul.f32 %v2531_v45, %v3537_v62  ;;  %v1429_v1 = vadd.f32 0.00028619796, %v1428_v46 }
 0x17b   : > { %v1468_v0 = vmul.f32 2.1237322e-06, %v3559_v22  ;;  %v965_v52 = vmul.f32 %v964_v53, %v3163_v11  ;;  %v1003_v26 = vmul.f32 %v1002_v31, %v3181_v43  ;;  %v1080_v33 = vadd.f32 0.001143296, %v1079_v9 }
 0x17c   : > { %v1944_v41 = vmul.f32 %v1912_v5, %v3237_v16  ;;  %v931_v63 = vsub.f32 1.0, %v930_v25  ;;  %v1041_v24 = vmul.f32 %v1040_v36, %v3201_v7  ;;  %v1352_v57 = vmul.f32 %v1351_v39, %v3502_v15 }
 0x17d   : > { %v940_v44 = vand.u32 2147483648, %v3537_v62  ;;  %v966_v17 = vadd.f32 0.4994258, %v965_v52  ;;  %v1004_v48 = vadd.f32 0.112945676, %v1003_v26  ;;  %vm935_vm12 = vweird.f32 %v2531_v45 }
 0x17e   : > { %v1391_v28 = vadd.f32 0.0036580483, %v1390_v4  ;;  %2043 = vmatmul.f32.gmra.mxu2 %v1944_v41  ;;  %v932_v46 = vmul.f32 %v2531_v45, %v931_v63  ;;  %v938_v53 = vand.u32 2147483647, %v3537_v62  ;;  %v1430_v31 = vmul.f32 %v1429_v1, %v3551_v18 }
 0x17f   : > { %v1469_v3 = vadd.f32 0.00028619796, %v1468_v0  ;;  %v967_v16 = vmul.f32 %v966_v17, %v3163_v11  ;;  %v1005_v36 = vmul.f32 %v1004_v48, %v3181_v43  ;;  %vm934_vm13 = vweird.f32 %v3537_v62 }
 0x180   : > { %v933_v9 = vadd.f32 %v2531_v45, %v932_v46  ;;  %v1042_v39 = vadd.f32 0.014752088, %v1041_v24  ;;  %v1081_v5 = vmul.f32 %v1080_v33, %v3243_v14  ;;  %v1353_v25 = vadd.f32 0.05243302, %v1352_v57  ;;  %vm936_vm14 = vmor %vm934_vm13, %vm935_vm12 }
 0x181   : > { %v941_v4 = vor.u32 1.1754944e-38, %v940_v44  ;;  %v3587_v52 = vadd.f32 1.0, %v967_v16  ;;  %v1006_v26 = vadd.f32 0.4994258, %v1005_v36  ;;  %v1316_v41 = vmul.f32 %v1315_v27, %v3425_v21  ;;  %v4344_v27 = vld [vmem:[#allocation27_spill] sm:$0xff] }
 0x182   : > { %v1392_v1 = vmul.f32 %v1391_v28, %v3525_v56  ;;  %v937_v0 = vsel %vm936_vm14, %v2531_v45, %v933_v9  ;;  %vm939_vm15 = vcmp.eq.f32.partialorder %v938_v53, 8.507059e+37  ;;  %v1431_v63 = vadd.f32 0.0036580483, %v1430_v31  ;;  %v482_v53 = vpop.f32.mrf.mxu0 }
 0x183   : > { %v942_v11 = vsel %vm939_vm15, %v941_v4, %v937_v0  ;;  %v1470_v17 = vmul.f32 %v1469_v3, %v3559_v22  ;;  %2532 = vrcp.f32 %v3587_v52  ;;  %v3595_v62 = vmul.f32 %v3546_v47, %v3311_v13  ;;  %v547_v0 = vpop.f32.mrf.mxu1 }
 0x184   : > { %v943_v24 = vmul.f32 %v942_v11, %v3341_v12  ;;  %v1043_v33 = vmul.f32 %v1042_v39, %v3201_v7  ;;  %v1082_v57 = vadd.f32 0.014752088, %v1081_v5  ;;  %v3601_v28 = vmul.f32 %v3549_v42, %v4344_v27 }
 0x185   : > { %v1277_v45 = vadd.f32 1.1283791, %v1276_v37  ;;  %v1354_v44 = vmul.f32 %v1353_v25, %v3502_v15  ;;  %v1007_v3 = vmul.f32 %v1006_v26, %v3181_v43  ;;  %v1317_v48 = vadd.f32 1.1283791, %v1316_v41  ;;  %v4347_v26 = vld [vmem:[#allocation20_spill] sm:$0xff] }
 0x186   : > { %v3606_v46 = vmul.f32 0.5, %v3465_v8  ;;  %v1393_v13 = vadd.f32 0.05243302, %v1392_v1  ;;  %v2393_v47 = vclamps-f32 %v943_v24, 1.0  ;;  %v1432_v12 = vmul.f32 %v1431_v63, %v3551_v18 }
 0x187   : > { %v1471_v31 = vadd.f32 0.0036580483, %v1470_v17  ;;  %v3609_v16 = vadd.f32 1.0, %v1007_v3  ;;  %v1119_v42 = vmul.f32 3.8918573e-05, %v3268_v2  ;;  %v3613_v37 = vmul.f32 0.5, %v3483_v60 }
 0x188   : > { %4345 = vst [vmem:[#allocation27_spill] sm:$0xff] %v3606_v46  ;;  %v1913_v36 = vadd.f32 1.0, %v2393_v47  ;;  %v1044_v9 = vadd.f32 0.112945676, %v1043_v33  ;;  %v1083_v43 = vmul.f32 %v1082_v57, %v3243_v14  ;;  %v3617_v8 = vmul.f32 %v1277_v45, %v3391_v34 }
 0x189   : > { %4346 = vst [vmem:[#allocation32_spill] sm:$0xff] %v3613_v37  ;;  %v2533_v39 = vpop.eup %2532  ;;  %v1355_v5 = vadd.f32 0.18741608, %v1354_v44  ;;  %2534 = vrcp.f32 %v3609_v16  ;;  %v3621_v25 = vadd.f32 %v482_v53, %v3006_v54  ;;  %v3624_v4 = vmul.f32 %v1317_v48, %v3399_v50 }
 0x18a   : > { %v1945_v60 = vmul.f32 %v1913_v36, %v4347_v26  ;;  %v3628_v41 = vmul.f32 0.5, %v3520_v6  ;;  %v970_v1 = vmul.f32 %v2533_v39, %v3587_v52  ;;  %v1394_v34 = vmul.f32 %v1393_v13, %v3525_v56 }
 0x18b   : > { %v1433_v11 = vadd.f32 0.05243302, %v1432_v12  ;;  %v1472_v63 = vmul.f32 %v1471_v31, %v3559_v22  ;;  %v1120_v17 = vadd.f32 0.001143296, %v1119_v42  ;;  %v978_v33 = vand.u32 2147483647, %v3587_v52 }
 0x18c   : > { %4348 = vst [vmem:[#allocation20_spill] sm:$0xff] %v3628_v41  ;;  %2108 = vmatmul.f32.gmra.mxu3 %v1945_v60  ;;  %v971_v24 = vsub.f32 1.0, %v970_v1  ;;  %v1045_v50 = vmul.f32 %v1044_v9, %v3201_v7  ;;  %v1084_v57 = vadd.f32 0.112945676, %v1083_v43  ;;  %v1356_v27 = vmul.f32 %v1355_v5, %v3502_v15 }
 0x18d   : > { %v980_v6 = vand.u32 2147483648, %v3587_v52  ;;  %v3638_v45 = vmul.f32 0.70710677, %v3621_v25  ;;  %v3641_v44 = vadd.f32 %v547_v0, %v3008_v55  ;;  %vm975_vm0 = vweird.f32 %v2533_v39 }
 0x18e   : > { %v972_v3 = vmul.f32 %v2533_v39, %v971_v24  ;;  %v1046_v48 = vadd.f32 0.4994258, %v1045_v50  ;;  %v1085_v13 = vmul.f32 %v1084_v57, %v3243_v14  ;;  %v1395_v53 = vadd.f32 0.18741608, %v1394_v34 }
 0x18f   : > { %v2535_v47 = vpop.eup %2534  ;;  %v1434_v12 = vmul.f32 %v1433_v11, %v3551_v18  ;;  %v1473_v31 = vadd.f32 0.05243302, %v1472_v63  ;;  %v1121_v42 = vmul.f32 %v1120_v17, %v3268_v2  ;;  %vm974_vm1 = vweird.f32 %v3587_v52 }
 0x190   : > { %v973_v36 = vadd.f32 %v2533_v39, %v972_v3  ;;  %vm979_vm2 = vcmp.eq.f32.partialorder %v978_v33, 8.507059e+37  ;;  %v1010_v9 = vmul.f32 %v2535_v47, %v3609_v16  ;;  %vm976_vm3 = vmor %vm974_vm1, %vm975_vm0  ;;  %v981_v43 = vor.u32 1.1754944e-38, %v980_v6  ;;  %v4349_v33 = vld [vmem:[#allocation28_spill] sm:$0xff] }
 0x191   : > { %v3649_v5 = vmul.f32 0.70710677, %v3641_v44  ;;  %v1047_v26 = vmul.f32 %v1046_v48, %v3201_v7  ;;  %v1086_v60 = vadd.f32 0.4994258, %v1085_v13  ;;  %v1020_v34 = vand.u32 2147483648, %v3609_v16 }
 0x192   : > { %v977_v1 = vsel %vm976_vm3, %v2533_v39, %v973_v36  ;;  %v1011_v0 = vsub.f32 1.0, %v1010_v9  ;;  %v1506_v11 = vmul.f32 %v3638_v45, %v3638_v45  ;;  %v1122_v24 = vadd.f32 0.014752088, %v1121_v42 }
 0x193   : > { %v982_v63 = vsel %vm979_vm2, %v981_v43, %v977_v1  ;;  %v3655_v52 = vadd.f32 1.0, %v1047_v26  ;;  %v1087_v17 = vmul.f32 %v1086_v60, %v3243_v14  ;;  %vm1015_vm4 = vweird.f32 %v2535_v47  ;;  %v485_v14 = vpop.f32.mrf.mxu0 }
 0x194   : > { %v983_v50 = vmul.f32 %v982_v63, %v4349_v33  ;;  %v1012_v57 = vmul.f32 %v2535_v47, %v1011_v0  ;;  %v1018_v7 = vand.u32 2147483647, %v3609_v16  ;;  %v1357_v6 = vadd.f32 1.1283791, %v1356_v27  ;;  %v550_v0 = vpop.f32.mrf.mxu1  ;;  %v4351_v63 = vld [vmem:[#allocation21_spill] sm:$0xff] }
 0x195   : > { %v1396_v39 = vmul.f32 %v1395_v53, %v3525_v56  ;;  %v1546_v3 = vmul.f32 %v3649_v5, %v3649_v5  ;;  %2536 = vrcp.f32 %v3655_v52  ;;  %v1435_v48 = vadd.f32 0.18741608, %v1434_v12 }
 0x196   : > { %v2394_v13 = vclamps-f32 %v983_v50, 1.0  ;;  %v1013_v36 = vadd.f32 %v2535_v47, %v1012_v57  ;;  %vm1014_vm5 = vweird.f32 %v3609_v16  ;;  %v1021_v42 = vor.u32 1.1754944e-38, %v1020_v34 }
 0x197   : > { %vm1016_vm6 = vmor %vm1014_vm5, %vm1015_vm4  ;;  %v3665_v9 = vmin.f32 %v1506_v11, 16.0  ;;  %v3667_v43 = vadd.f32 1.0, %v1087_v17  ;;  %v1123_v27 = vmul.f32 %v1122_v24, %v3268_v2  ;;  %v1474_v53 = vmul.f32 %v1473_v31, %v3559_v22 }
 0x198   : > { %v1914_v26 = vadd.f32 1.0, %v2394_v13  ;;  %v1017_v60 = vsel %vm1016_vm6, %v2535_v47, %v1013_v36  ;;  %vm1019_vm7 = vcmp.eq.f32.partialorder %v1018_v7, 8.507059e+37  ;;  %v3671_v12 = vmin.f32 %v1546_v3, 16.0 }
 0x199   : > { %v1022_v1 = vsel %vm1019_vm7, %v1021_v42, %v1017_v60  ;;  %2538 = vrcp.f32 %v3667_v43  ;;  %v3675_v16 = vadd.f32 %v485_v14, %v3006_v54  ;;  %v3677_v34 = vadd.f32 1.1283791, %v1396_v39 }
 0x19a   : > { %v3680_v11 = vmul.f32 0.5, %v3523_v35  ;;  %v1946_v17 = vmul.f32 %v1914_v26, %v4351_v63  ;;  %v1023_v31 = vmul.f32 %v1022_v1, %v3384_v32  ;;  %v3685_v24 = vmul.f32 %v1357_v6, %v3477_v58 }
 0x19b   : > { %v2537_v47 = vpop.eup %2536  ;;  %v1508_v33 = vmul.f32 2.1237322e-06, %v3665_v9  ;;  %v1124_v50 = vadd.f32 0.112945676, %v1123_v27  ;;  %v1159_v57 = vmul.f32 3.8918573e-05, %v3308_v61  ;;  %v3693_v3 = vadd.f32 %v550_v0, %v3008_v55 }
 0x19c   : > { %4350 = vst [vmem:[#allocation28_spill] sm:$0xff] %v3680_v11  ;;  %v3689_v7 = vadd.f32 0.18741608, %v1474_v53  ;;  %2046 = vmatmul.f32.gmra.mxu2 %v1946_v17  ;;  %v2395_v39 = vclamps-f32 %v1023_v31, 1.0  ;;  %v1050_v35 = vmul.f32 %v2537_v47, %v3655_v52  ;;  %v1436_v32 = vmul.f32 %v1435_v48, %v3551_v18  ;;  %v4352_v48 = vld [vmem:[#allocation22_spill] sm:$0xff] }
 0x19d   : > { %v1548_v13 = vmul.f32 2.1237322e-06, %v3671_v12  ;;  %v1058_v58 = vand.u32 2147483647, %v3655_v52  ;;  %v3699_v6 = vmul.f32 0.70710677, %v3675_v16  ;;  %vm1055_vm8 = vweird.f32 %v2537_v47 }
 0x19e   : > { %v1915_v36 = vadd.f32 1.0, %v2395_v39  ;;  %v1051_v14 = vsub.f32 1.0, %v1050_v35  ;;  %v1060_v42 = vand.u32 2147483648, %v3655_v52  ;;  %v1199_v27 = vmul.f32 3.8918573e-05, %v3350_v30 }
 0x19f   : > { %v2539_v53 = vpop.eup %2538  ;;  %v1509_v26 = vadd.f32 0.00028619796, %v1508_v33  ;;  %v1125_v60 = vmul.f32 %v1124_v50, %v3268_v2  ;;  %v1160_v1 = vadd.f32 0.001143296, %v1159_v57  ;;  %v3707_v31 = vmul.f32 0.70710677, %v3693_v3 }
 0x1a0   : > { %v1947_v0 = vmul.f32 %v1915_v36, %v4352_v48  ;;  %v1052_v63 = vmul.f32 %v2537_v47, %v1051_v14  ;;  %v1090_v17 = vmul.f32 %v2539_v53, %v3667_v43  ;;  %v1549_v39 = vadd.f32 0.00028619796, %v1548_v13 }
 0x1a1   : > { %vm1054_vm9 = vweird.f32 %v3655_v52  ;;  %vm3710_vm10 = vcmp.eq.f32.partialorder %v1058_v58, 8.507059e+37  ;;  %v1586_v33 = vmul.f32 %v3699_v6, %v3699_v6  ;;  %v1061_v57 = vor.u32 1.1754944e-38, %v1060_v42 }
 0x1a2   : > { %2111 = vmatmul.f32.gmra.mxu3 %v1947_v0  ;;  %v1053_v50 = vadd.f32 %v2537_v47, %v1052_v63  ;;  %v1091_v36 = vsub.f32 1.0, %v1090_v17  ;;  %v1126_v14 = vadd.f32 0.4994258, %v1125_v60  ;;  %vm1056_vm11 = vmor %vm1054_vm9, %vm1055_vm8  ;;  %vm1095_vm12 = vweird.f32 %v2539_v53 }
 0x1a3   : > { %v1098_v48 = vand.u32 2147483647, %v3667_v43  ;;  %v1100_v13 = vand.u32 2147483648, %v3667_v43  ;;  %v1161_v52 = vmul.f32 %v1160_v1, %v3308_v61  ;;  %v1626_v41 = vmul.f32 %v3707_v31, %v3707_v31 }
 0x1a4   : > { %v1057_v58 = vsel %vm1056_vm11, %v2537_v47, %v1053_v50  ;;  %v1092_v11 = vmul.f32 %v2539_v53, %v1091_v36  ;;  %v1127_v0 = vmul.f32 %v1126_v14, %v3268_v2  ;;  %v1510_v42 = vmul.f32 %v1509_v26, %v3665_v9 }
 0x1a5   : > { %v1062_v60 = vsel %vm3710_vm10, %v1061_v57, %v1057_v58  ;;  %v3726_v63 = vmin.f32 %v1586_v33, 16.0  ;;  %v1162_v17 = vadd.f32 0.014752088, %v1161_v52  ;;  %vm1094_vm13 = vweird.f32 %v3667_v43 }
 0x1a6   : > { %v1063_v37 = vmul.f32 %v1062_v60, %v3394_v23  ;;  %v1093_v46 = vadd.f32 %v2539_v53, %v1092_v11  ;;  %v3730_v47 = vadd.f32 1.0, %v1127_v0  ;;  %vm1096_vm14 = vmor %vm1094_vm13, %vm1095_vm12  ;;  %vm1099_vm15 = vcmp.eq.f32.partialorder %v1098_v48, 8.507059e+37 }
 0x1a7   : > { %v1101_v1 = vor.u32 1.1754944e-38, %v1100_v13  ;;  %v1163_v2 = vmul.f32 %v1162_v17, %v3308_v61  ;;  %v1200_v26 = vadd.f32 0.001143296, %v1199_v27  ;;  %v3734_v57 = vmin.f32 %v1626_v41, 16.0 }
 0x1a8   : > { %v2396_v50 = vclamps-f32 %v1063_v37, 1.0  ;;  %v1097_v35 = vsel %vm1096_vm14, %v2539_v53, %v1093_v46  ;;  %2540 = vrcp.f32 %v3730_v47  ;;  %v3738_v23 = vmul.f32 0.5, %v3621_v25  ;;  %v4357_v53 = vld [vmem:[#allocation23_spill] sm:$0xff] }
 0x1a9   : > { %v1550_v43 = vmul.f32 %v1549_v39, %v3671_v12  ;;  %v1102_v11 = vsel %vm1099_vm15, %v1101_v1, %v1097_v35  ;;  %v1588_v33 = vmul.f32 2.1237322e-06, %v3726_v63  ;;  %v3742_v36 = vadd.f32 1.1283791, %v1436_v32 }
 0x1aa   : > { %4355 = vst [vmem:[#allocation21_spill] sm:$0xff] %v3738_v23  ;;  %v1916_v14 = vadd.f32 1.0, %v2396_v50  ;;  %v1103_v48 = vmul.f32 %v1102_v11, %v3446_v51  ;;  %v1164_v27 = vadd.f32 0.112945676, %v1163_v2  ;;  %v1511_v37 = vadd.f32 0.0036580483, %v1510_v42  ;;  %v488_v42 = vpop.f32.mrf.mxu0 }
 0x1ab   : > { %v3746_v46 = vmul.f32 0.5, %v3641_v44  ;;  %v1201_v41 = vmul.f32 %v1200_v26, %v3350_v30  ;;  %v1239_v25 = vmul.f32 3.8918573e-05, %v3361_v20  ;;  %v1628_v52 = vmul.f32 2.1237322e-06, %v3734_v57  ;;  %v553_v44 = vpop.f32.mrf.mxu1  ;;  %v4359_v11 = vld [vmem:[#allocation24_spill] sm:$0xff] }
 0x1ac   : > { %v1948_v13 = vmul.f32 %v1916_v14, %v4357_v53  ;;  %v2397_v39 = vclamps-f32 %v1103_v48, 1.0  ;;  %v1165_v32 = vmul.f32 %v1164_v27, %v3308_v61  ;;  %v3755_v58 = vmul.f32 %v3677_v34, %v3497_v38 }
 0x1ad   : > { %4356 = vst [vmem:[#allocation22_spill] sm:$0xff] %v3746_v46  ;;  %v1551_v51 = vadd.f32 0.0036580483, %v1550_v43  ;;  %v1589_v0 = vadd.f32 0.00028619796, %v1588_v33  ;;  %v3758_v26 = vadd.f32 %v488_v42, %v3006_v54  ;;  %v3761_v50 = vadd.f32 %v553_v44, %v3008_v55 }
 0x1ae   : > { %v1202_v60 = vadd.f32 0.014752088, %v1201_v41  ;;  %v2541_v17 = vpop.eup %2540  ;;  %2049 = vmatmul.f32.gmra.mxu2 %v1948_v13  ;;  %v1917_v1 = vadd.f32 1.0, %v2397_v39  ;;  %v1166_v2 = vadd.f32 0.4994258, %v1165_v32  ;;  %v1476_v35 = vmul.f32 %v3689_v7, %v3559_v22 }
 0x1af   : > { %4358 = vst [vmem:[#allocation23_spill] sm:$0xff] %v3761_v50  ;;  %v1512_v38 = vmul.f32 %v1511_v37, %v3665_v9  ;;  %v1130_v34 = vmul.f32 %v2541_v17, %v3730_v47  ;;  %v1240_v43 = vadd.f32 0.001143296, %v1239_v25  ;;  %v1629_v14 = vadd.f32 0.00028619796, %v1628_v52 }
 0x1b0   : > { %v1949_v33 = vmul.f32 %v1917_v1, %v4359_v11  ;;  %v1167_v48 = vmul.f32 %v1166_v2, %v3308_v61  ;;  %v3770_v27 = vmul.f32 0.70710677, %v3758_v26  ;;  %v1552_v41 = vmul.f32 %v1551_v51, %v3671_v12 }
 0x1b1   : > { %v1590_v53 = vmul.f32 %v1589_v0, %v3726_v63  ;;  %v1131_v13 = vsub.f32 1.0, %v1130_v34  ;;  %v1140_v7 = vand.u32 2147483648, %v3730_v47  ;;  %v3780_v39 = vmul.f32 0.70710677, %v3761_v50 }
 0x1b2   : > { %2114 = vmatmul.f32.gmra.mxu3 %v1949_v33  ;;  %v3775_v37 = vadd.f32 1.0, %v1167_v48  ;;  %v1666_v25 = vmul.f32 %v3770_v27, %v3770_v27  ;;  %v1203_v61 = vmul.f32 %v1202_v60, %v3350_v30  ;;  %vm1135_vm0 = vweird.f32 %v2541_v17 }
 0x1b3   : > { %v1132_v52 = vmul.f32 %v2541_v17, %v1131_v13  ;;  %v1138_v32 = vand.u32 2147483647, %v3730_v47  ;;  %v1241_v51 = vmul.f32 %v1240_v43, %v3361_v20  ;;  %v3785_v0 = vadd.f32 1.1283791, %v1476_v35 }
 0x1b4   : > { %v1513_v42 = vadd.f32 0.05243302, %v1512_v38  ;;  %v1630_v44 = vmul.f32 %v1629_v14, %v3734_v57  ;;  %2542 = vrcp.f32 %v3775_v37  ;;  %v1553_v1 = vadd.f32 0.05243302, %v1552_v41 }
 0x1b5   : > { %v1133_v2 = vadd.f32 %v2541_v17, %v1132_v52  ;;  %vm1134_vm1 = vweird.f32 %v3730_v47  ;;  %v3790_v34 = vmin.f32 %v1666_v25, 16.0  ;;  %v1591_v60 = vadd.f32 0.0036580483, %v1590_v53 }
 0x1b6   : > { %vm1136_vm2 = vmor %vm1134_vm1, %vm1135_vm0  ;;  %v1141_v11 = vor.u32 1.1754944e-38, %v1140_v7  ;;  %v1706_v33 = vmul.f32 %v3780_v39, %v3780_v39  ;;  %v1204_v43 = vadd.f32 0.112945676, %v1203_v61  ;;  %vm1139_vm3 = vcmp.eq.f32.partialorder %v1138_v32, 8.507059e+37 }
 0x1b7   : > { %v1137_v35 = vsel %vm1136_vm2, %v2541_v17, %v1133_v2  ;;  %v1668_v38 = vmul.f32 2.1237322e-06, %v3790_v34  ;;  %v1242_v14 = vadd.f32 0.014752088, %v1241_v51  ;;  %v1631_v48 = vadd.f32 0.0036580483, %v1630_v44 }
 0x1b8   : > { %v1142_v13 = vsel %vm1139_vm3, %v1141_v11, %v1137_v35  ;;  %v3795_v41 = vmin.f32 %v1706_v33, 16.0  ;;  %v1205_v47 = vmul.f32 %v1204_v43, %v3350_v30  ;;  %v3799_v25 = vmul.f32 0.5, %v3675_v16 }
 0x1b9   : > { %v1143_v53 = vmul.f32 %v1142_v13, %v3455_v59  ;;  %v1243_v7 = vmul.f32 %v1242_v14, %v3361_v20  ;;  %v1279_v61 = vmul.f32 3.8918573e-05, %v3421_v29  ;;  %v3806_v52 = vmul.f32 %v3742_v36, %v3532_v40 }
 0x1ba   : > { %4360 = vst [vmem:[#allocation24_spill] sm:$0xff] %v3799_v25  ;;  %v2543_v17 = vpop.eup %2542  ;;  %v1669_v32 = vadd.f32 0.00028619796, %v1668_v38  ;;  %v1708_v51 = vmul.f32 2.1237322e-06, %v3795_v41  ;;  %v1514_v2 = vmul.f32 %v1513_v42, %v3665_v9  ;;  %v1554_v16 = vmul.f32 %v1553_v1, %v3671_v12 }
 0x1bb   : > { %v1206_v44 = vadd.f32 0.4994258, %v1205_v47  ;;  %v2398_v11 = vclamps-f32 %v1143_v53, 1.0  ;;  %v1170_v59 = vmul.f32 %v2543_v17, %v3775_v37  ;;  %v1592_v33 = vmul.f32 %v1591_v60, %v3726_v63  ;;  %v4361_v53 = vld [vmem:[#allocation25_spill] sm:$0xff] }
 0x1bc   : > { %v1632_v43 = vmul.f32 %v1631_v48, %v3734_v57  ;;  %v1244_v14 = vadd.f32 0.112945676, %v1243_v7  ;;  %v1180_v38 = vand.u32 2147483648, %v3775_v37  ;;  %v1280_v13 = vadd.f32 0.001143296, %v1279_v61 }
 0x1bd   : > { %v1207_v35 = vmul.f32 %v1206_v44, %v3350_v30  ;;  %v1918_v40 = vadd.f32 1.0, %v2398_v11  ;;  %v1171_v36 = vsub.f32 1.0, %v1170_v59  ;;  %v1670_v47 = vmul.f32 %v1669_v32, %v3790_v34  ;;  %v491_v44 = vpop.f32.mrf.mxu0  ;;  %v556_v11 = vpop.f32.mrf.mxu1 }
 0x1be   : > { %v1709_v42 = vadd.f32 0.00028619796, %v1708_v51  ;;  %v1245_v1 = vmul.f32 %v1244_v14, %v3361_v20  ;;  %vm1175_vm4 = vweird.f32 %v2543_v17  ;;  %v1178_v48 = vand.u32 2147483647, %v3775_v37 }
 0x1bf   : > { %v3817_v50 = vadd.f32 1.0, %v1207_v35  ;;  %v1950_v25 = vmul.f32 %v1918_v40, %v4361_v53  ;;  %v1172_v60 = vmul.f32 %v2543_v17, %v1171_v36  ;;  %v3822_v30 = vadd.f32 0.18741608, %v1514_v2 }
 0x1c0   : > { %v1593_v7 = vadd.f32 0.05243302, %v1592_v33  ;;  %vm1174_vm5 = vweird.f32 %v3775_v37  ;;  %v1181_v32 = vor.u32 1.1754944e-38, %v1180_v38  ;;  %v1246_v51 = vadd.f32 0.4994258, %v1245_v1 }
 0x1c1   : > { %2544 = vrcp.f32 %v3817_v50  ;;  %2052 = vmatmul.f32.gmra.mxu2 %v1950_v25  ;;  %v1173_v61 = vadd.f32 %v2543_v17, %v1172_v60  ;;  %v1281_v59 = vmul.f32 %v1280_v13, %v3421_v29  ;;  %vm1176_vm6 = vmor %vm1174_vm5, %vm1175_vm4  ;;  %v1671_v35 = vadd.f32 0.0036580483, %v1670_v47 }
 0x1c2   : > { %v1710_v14 = vmul.f32 %v1709_v42, %v3795_v41  ;;  %v3829_v2 = vadd.f32 %v491_v44, %v3006_v54  ;;  %v3832_v33 = vadd.f32 %v556_v11, %v3008_v55  ;;  %v1633_v37 = vadd.f32 0.05243302, %v1632_v43 }
 0x1c3   : > { %v1177_v40 = vsel %vm1176_vm6, %v2543_v17, %v1173_v61  ;;  %vm1179_vm7 = vcmp.eq.f32.partialorder %v1178_v48, 8.507059e+37  ;;  %v1247_v25 = vmul.f32 %v1246_v51, %v3361_v20  ;;  %v1594_v36 = vmul.f32 %v1593_v7, %v3726_v63 }
 0x1c4   : > { %4362 = vst [vmem:[#allocation25_spill] sm:$0xff] %v3829_v2  ;;  %v1182_v38 = vsel %vm1179_vm7, %v1181_v32, %v1177_v40  ;;  %v3837_v13 = vmul.f32 0.70710677, %v3829_v2  ;;  %v1319_v47 = vmul.f32 3.8918573e-05, %v3425_v21  ;;  %v1672_v17 = vmul.f32 %v1671_v35, %v3790_v34 }
 0x1c5   : > { %4363 = vst [vmem:[#allocation33_spill] sm:$0xff] %v3832_v33  ;;  %v3840_v42 = vadd.f32 0.18741608, %v1554_v16  ;;  %v1183_v1 = vmul.f32 %v1182_v38, %v3569_v10  ;;  %v3843_v53 = vadd.f32 1.0, %v1247_v25  ;;  %v1282_v60 = vadd.f32 0.014752088, %v1281_v59 }
 0x1c6   : > { %4364 = vst [vmem:[#allocation34_spill] sm:$0xff] %v3837_v13  ;;  %v1711_v48 = vadd.f32 0.0036580483, %v1710_v14  ;;  %v1746_v20 = vmul.f32 %v3837_v13, %v3837_v13  ;;  %v3849_v7 = vmul.f32 0.70710677, %v3832_v33  ;;  %v3852_v61 = vmul.f32 0.5, %v3693_v3 }
 0x1c7   : > { %v2545_v43 = vpop.eup %2544  ;;  %v1634_v16 = vmul.f32 %v1633_v37, %v3734_v57  ;;  %v2399_v32 = vclamps-f32 %v1183_v1, 1.0  ;;  %v3856_v51 = vadd.f32 0.18741608, %v1594_v36  ;;  %v1218_v44 = vand.u32 2147483647, %v3817_v50  ;;  %v4367_v1 = vld [vmem:[#allocation26_spill] sm:$0xff] }
 0x1c8   : > { %4365 = vst [vmem:[#allocation35_spill] sm:$0xff] %v3849_v7  ;;  %v1210_v10 = vmul.f32 %v2545_v43, %v3817_v50  ;;  %2546 = vrcp.f32 %v3843_v53  ;;  %v1320_v11 = vadd.f32 0.001143296, %v1319_v47  ;;  %v1220_v14 = vand.u32 2147483648, %v3817_v50 }
 0x1c9   : > { %4366 = vst [vmem:[#allocation36_spill] sm:$0xff] %v3852_v61  ;;  %v1919_v59 = vadd.f32 1.0, %v2399_v32  ;;  %v1283_v40 = vmul.f32 %v1282_v60, %v3421_v29  ;;  %v1673_v3 = vadd.f32 0.05243302, %v1672_v17  ;;  %v1712_v25 = vmul.f32 %v1711_v48, %v3795_v41 }
 0x1ca   : > { %v1211_v35 = vsub.f32 1.0, %v1210_v10  ;;  %v3863_v37 = vmin.f32 %v1746_v20, 16.0  ;;  %v1786_v36 = vmul.f32 %v3849_v7, %v3849_v7  ;;  %v3867_v38 = vadd.f32 0.18741608, %v1634_v16 }
 0x1cb   : > { %v1951_v33 = vmul.f32 %v1919_v59, %v4367_v1  ;;  %vm1215_vm8 = vweird.f32 %v2545_v43  ;;  %vm1214_vm9 = vweird.f32 %v3817_v50  ;;  %v1321_v60 = vmul.f32 %v1320_v11, %v3425_v21 }
 0x1cc   : > { %v1212_v2 = vmul.f32 %v2545_v43, %v1211_v35  ;;  %v1748_v47 = vmul.f32 2.1237322e-06, %v3863_v37  ;;  %v3872_v32 = vmin.f32 %v1786_v36, 16.0  ;;  %vm1219_vm10 = vcmp.eq.f32.partialorder %v1218_v44, 8.507059e+37  ;;  %vm1216_vm11 = vmor %vm1214_vm9, %vm1215_vm8 }
 0x1cd   : > { %2117 = vmatmul.f32.gmra.mxu3 %v1951_v33  ;;  %v1221_v48 = vor.u32 1.1754944e-38, %v1220_v14  ;;  %v1284_v20 = vadd.f32 0.112945676, %v1283_v40  ;;  %v1674_v16 = vmul.f32 %v1673_v3, %v3790_v34  ;;  %v1713_v7 = vadd.f32 0.05243302, %v1712_v25 }
 0x1ce   : > { %v1213_v17 = vadd.f32 %v2545_v43, %v1212_v2  ;;  %v2547_v10 = vpop.eup %2546  ;;  %v1749_v59 = vadd.f32 0.00028619796, %v1748_v47  ;;  %v1322_v35 = vadd.f32 0.014752088, %v1321_v60  ;;  %v1359_v13 = vmul.f32 3.8918573e-05, %v3502_v15 }
 0x1cf   : > { %v1250_v50 = vmul.f32 %v2547_v10, %v3843_v53  ;;  %v1285_v36 = vmul.f32 %v1284_v20, %v3421_v29  ;;  %v1788_v33 = vmul.f32 2.1237322e-06, %v3872_v32  ;;  %v1399_v25 = vmul.f32 3.8918573e-05, %v3525_v56 }
 0x1d0   : > { %v1217_v1 = vsel %vm1216_vm11, %v2545_v43, %v1213_v17  ;;  %v1750_v2 = vmul.f32 %v1749_v59, %v3863_v37  ;;  %v1323_v44 = vmul.f32 %v1322_v35, %v3425_v21  ;;  %vm1254_vm12 = vweird.f32 %v3843_v53 }
 0x1d1   : > { %v1222_v11 = vsel %vm1219_vm10, %v1221_v48, %v1217_v1  ;;  %v1251_v40 = vsub.f32 1.0, %v1250_v50  ;;  %v1286_v3 = vadd.f32 0.4994258, %v1285_v36  ;;  %v1258_v43 = vand.u32 2147483647, %v3843_v53 }
 0x1d2   : > { %v1223_v14 = vmul.f32 %v1222_v11, %v3595_v62  ;;  %v1260_v47 = vand.u32 2147483648, %v3843_v53  ;;  %v1324_v60 = vadd.f32 0.112945676, %v1323_v44  ;;  %vm1255_vm13 = vweird.f32 %v2547_v10 }
 0x1d3   : > { %v1252_v48 = vmul.f32 %v2547_v10, %v1251_v40  ;;  %v1287_v20 = vmul.f32 %v1286_v3, %v3421_v29  ;;  %v1751_v59 = vadd.f32 0.0036580483, %v1750_v2  ;;  %v1789_v35 = vadd.f32 0.00028619796, %v1788_v33  ;;  %vm1256_vm14 = vmor %vm1254_vm12, %vm1255_vm13  ;;  %v4368_v29 = vld [vmem:[#allocation29_spill] sm:$0xff] }
 0x1d4   : > { %v2400_v17 = vclamps-f32 %v1223_v14, 1.0  ;;  %v1325_v62 = vmul.f32 %v1324_v60, %v3425_v21  ;;  %v1360_v1 = vadd.f32 0.001143296, %v1359_v13  ;;  %v1400_v61 = vadd.f32 0.001143296, %v1399_v25  ;;  %v494_v25 = vpop.f32.mrf.mxu0 }
 0x1d5   : > { %v1253_v36 = vadd.f32 %v2547_v10, %v1252_v48  ;;  %v3889_v11 = vadd.f32 1.0, %v1287_v20  ;;  %v1516_v46 = vmul.f32 %v3822_v30, %v3665_v9  ;;  %v1675_v23 = vadd.f32 0.18741608, %v1674_v16 }
 0x1d6   : > { %v1920_v50 = vadd.f32 1.0, %v2400_v17  ;;  %v1261_v44 = vor.u32 1.1754944e-38, %v1260_v47  ;;  %v1326_v14 = vadd.f32 0.4994258, %v1325_v62  ;;  %vm1259_vm15 = vcmp.eq.f32.partialorder %v1258_v43, 8.507059e+37 }
 0x1d7   : > { %v1257_v33 = vsel %vm1256_vm14, %v2547_v10, %v1253_v36  ;;  %2548 = vrcp.f32 %v3889_v11  ;;  %v1714_v13 = vmul.f32 %v1713_v7, %v3795_v41  ;;  %v1790_v3 = vmul.f32 %v1789_v35, %v3872_v32 }
 0x1d8   : > { %v1952_v2 = vmul.f32 %v1920_v50, %v4368_v29  ;;  %v1262_v40 = vsel %vm1259_vm15, %v1261_v44, %v1257_v33  ;;  %v1361_v30 = vmul.f32 %v1360_v1, %v3502_v15  ;;  %v1752_v16 = vmul.f32 %v1751_v59, %v3863_v37 }
 0x1d9   : > { %v1263_v53 = vmul.f32 %v1262_v40, %v3601_v28  ;;  %v1327_v47 = vmul.f32 %v1326_v14, %v3425_v21  ;;  %v1401_v10 = vmul.f32 %v1400_v61, %v3525_v56  ;;  %v3904_v43 = vadd.f32 1.1283791, %v1516_v46  ;;  %v559_v14 = vpop.f32.mrf.mxu1 }
 0x1da   : > { %2055 = vmatmul.f32.gmra.mxu2 %v1952_v2  ;;  %v1556_v7 = vmul.f32 %v3840_v42, %v3671_v12  ;;  %v1596_v60 = vmul.f32 %v3856_v51, %v3726_v63  ;;  %v1636_v17 = vmul.f32 %v3867_v38, %v3734_v57  ;;  %v1676_v48 = vmul.f32 %v1675_v23, %v3790_v34 }
 0x1db   : > { %v2401_v28 = vclamps-f32 %v1263_v53, 1.0  ;;  %v3913_v20 = vadd.f32 1.0, %v1327_v47  ;;  %v3916_v21 = vadd.f32 %v494_v25, %v3006_v54  ;;  %v3920_v46 = vmul.f32 %v3785_v0, %v3542_v49 }
 0x1dc   : > { %v1715_v61 = vadd.f32 0.18741608, %v1714_v13  ;;  %v1791_v42 = vadd.f32 0.0036580483, %v1790_v3  ;;  %v1362_v59 = vadd.f32 0.014752088, %v1361_v30  ;;  %vm1294_vm0 = vweird.f32 %v3889_v11 }
 0x1dd   : > { %v2549_v35 = vpop.eup %2548  ;;  %v1921_v51 = vadd.f32 1.0, %v2401_v28  ;;  %v1753_v62 = vadd.f32 0.05243302, %v1752_v16  ;;  %2550 = vrcp.f32 %v3913_v20  ;;  %v1402_v38 = vadd.f32 0.014752088, %v1401_v10 }
 0x1de   : > { %v3923_v23 = vadd.f32 1.1283791, %v1556_v7  ;;  %v3925_v1 = vadd.f32 1.1283791, %v1596_v60  ;;  %v3927_v50 = vadd.f32 1.1283791, %v1636_v17  ;;  %v1290_v54 = vmul.f32 %v2549_v35, %v3889_v11 }
 0x1df   : > { %v3930_v36 = vadd.f32 1.1283791, %v1676_v48  ;;  %v1953_v49 = vmul.f32 %v1921_v51, %v3458_v19  ;;  %v1298_v0 = vand.u32 2147483647, %v3889_v11  ;;  %v3935_v44 = vmul.f32 0.70710677, %v3916_v21 }
 0x1e0   : > { %v1716_v29 = vmul.f32 %v1715_v61, %v3795_v41  ;;  %v1792_v2 = vmul.f32 %v1791_v42, %v3872_v32  ;;  %v1291_v33 = vsub.f32 1.0, %v1290_v54  ;;  %v1300_v13 = vand.u32 2147483648, %v3889_v11 }
 0x1e1   : > { %2120 = vmatmul.f32.gmra.mxu3 %v1953_v49  ;;  %v1754_v40 = vmul.f32 %v1753_v62, %v3863_v37  ;;  %v1363_v19 = vmul.f32 %v1362_v59, %v3502_v15  ;;  %v1403_v3 = vmul.f32 %v1402_v38, %v3525_v56  ;;  %vm1295_vm1 = vweird.f32 %v2549_v35 }
 0x1e2   : > { %v1292_v25 = vmul.f32 %v2549_v35, %v1291_v33  ;;  %v3945_v30 = vadd.f32 %v559_v14, %v3008_v55  ;;  %v1439_v53 = vmul.f32 3.8918573e-05, %v3551_v18  ;;  %vm3948_vm2 = vcmp.eq.f32.partialorder %v1298_v0, 8.507059e+37  ;;  %vm1296_vm3 = vmor %vm1294_vm0, %vm1295_vm1 }
 0x1e3   : > { %v2551_v16 = vpop.eup %2550  ;;  %v1826_v10 = vmul.f32 %v3935_v44, %v3935_v44  ;;  %v1364_v7 = vadd.f32 0.112945676, %v1363_v19  ;;  %v1404_v60 = vadd.f32 0.112945676, %v1403_v3  ;;  %v1301_v48 = vor.u32 1.1754944e-38, %v1300_v13 }
 0x1e4   : > { %v1293_v17 = vadd.f32 %v2549_v35, %v1292_v25  ;;  %v1330_v28 = vmul.f32 %v2551_v16, %v3913_v20  ;;  %v1338_v61 = vand.u32 2147483647, %v3913_v20  ;;  %v1340_v55 = vand.u32 2147483648, %v3913_v20 }
 0x1e5   : > { %v1365_v42 = vmul.f32 %v1364_v7, %v3502_v15  ;;  %v1405_v59 = vmul.f32 %v1404_v60, %v3525_v56  ;;  %v1440_v51 = vadd.f32 0.001143296, %v1439_v53  ;;  %v3962_v54 = vmul.f32 0.70710677, %v3945_v30 }
 0x1e6   : > { %v1297_v62 = vsel %vm1296_vm3, %v2549_v35, %v1293_v17  ;;  %v1331_v38 = vsub.f32 1.0, %v1330_v28  ;;  %v1479_v49 = vmul.f32 3.8918573e-05, %v3559_v22  ;;  %v3967_v14 = vmin.f32 %v1826_v10, 16.0 }
 0x1e7   : > { %v1302_v0 = vsel %vm3948_vm2, %v1301_v48, %v1297_v62  ;;  %v1366_v11 = vadd.f32 0.4994258, %v1365_v42  ;;  %v1406_v33 = vadd.f32 0.4994258, %v1405_v59  ;;  %vm1335_vm4 = vweird.f32 %v2551_v16 }
 0x1e8   : > { %v1303_v13 = vmul.f32 %v1302_v0, %v3617_v8  ;;  %v1332_v19 = vmul.f32 %v2551_v16, %v1331_v38  ;;  %v1441_v3 = vmul.f32 %v1440_v51, %v3551_v18  ;;  %v1793_v35 = vadd.f32 0.05243302, %v1792_v2 }
 0x1e9   : > { %vm1334_vm5 = vweird.f32 %v3913_v20  ;;  %v1367_v25 = vmul.f32 %v1366_v11, %v3502_v15  ;;  %v1407_v53 = vmul.f32 %v1406_v33, %v3525_v56  ;;  %v1480_v10 = vadd.f32 0.001143296, %v1479_v49 }
 0x1ea   : > { %v2402_v7 = vclamps-f32 %v1303_v13, 1.0  ;;  %v1333_v47 = vadd.f32 %v2551_v16, %v1332_v19  ;;  %v1442_v60 = vadd.f32 0.014752088, %v1441_v3  ;;  %vm1336_vm6 = vmor %vm1334_vm5, %vm1335_vm4  ;;  %v1341_v17 = vor.u32 1.1754944e-38, %v1340_v55  ;;  %v4371_v55 = vld [vmem:[#allocation30_spill] sm:$0xff] }
 0x1eb   : > { %v1866_v8 = vmul.f32 %v3962_v54, %v3962_v54  ;;  %v3976_v48 = vadd.f32 1.0, %v1367_v25  ;;  %v3978_v28 = vadd.f32 1.0, %v1407_v53  ;;  %vm1339_vm7 = vcmp.eq.f32.partialorder %v1338_v61, 8.507059e+37 }
 0x1ec   : > { %v1922_v2 = vadd.f32 1.0, %v2402_v7  ;;  %v1337_v42 = vsel %vm1336_vm6, %v2551_v16, %v1333_v47  ;;  %v1828_v15 = vmul.f32 2.1237322e-06, %v3967_v14  ;;  %v1717_v20 = vadd.f32 1.1283791, %v1716_v29 }
 0x1ed   : > { %v1342_v56 = vsel %vm1339_vm7, %v1341_v17, %v1337_v42  ;;  %2552 = vrcp.f32 %v3976_v48  ;;  %v1443_v59 = vmul.f32 %v1442_v60, %v3551_v18  ;;  %v1755_v51 = vadd.f32 0.18741608, %v1754_v40 }
 0x1ee   : > { %v1954_v62 = vmul.f32 %v1922_v2, %v4371_v55  ;;  %v1343_v38 = vmul.f32 %v1342_v56, %v3624_v4  ;;  %v1481_v49 = vmul.f32 %v1480_v10, %v3559_v22  ;;  %v3988_v0 = vmul.f32 %v3904_v43, %v3638_v45 }
 0x1ef   : > { %v1794_v16 = vmul.f32 %v1793_v35, %v3872_v32  ;;  %v3991_v61 = vmin.f32 %v1866_v8, 16.0  ;;  %2554 = vrcp.f32 %v3978_v28  ;;  %v3996_v29 = vmul.f32 %v3923_v23, %v3649_v5 }
 0x1f0   : > { %v3999_v40 = vmul.f32 0.5, %v3758_v26  ;;  %2058 = vmatmul.f32.gmra.mxu2 %v1954_v62  ;;  %v2403_v4 = vclamps-f32 %v1343_v38, 1.0  ;;  %v1829_v11 = vadd.f32 0.00028619796, %v1828_v15  ;;  %v4003_v45 = vmul.f32 %v3925_v1, %v3699_v6 }
 0x1f1   : > { %v4007_v43 = vmul.f32 %v3927_v50, %v3707_v31  ;;  %v4011_v33 = vmul.f32 %v3930_v36, %v3770_v27  ;;  %v1444_v5 = vadd.f32 0.112945676, %v1443_v59  ;;  %v4014_v23 = vmul.f32 %v1717_v20, %v3780_v39  ;;  %v4372_v27 = vld [vmem:[#allocation31_spill] sm:$0xff] }
 0x1f2   : > { %v4017_v26 = vmul.f32 %v1755_v51, %v3863_v37  ;;  %v1923_v13 = vadd.f32 1.0, %v2403_v4  ;;  %v1482_v19 = vadd.f32 0.014752088, %v1481_v49  ;;  %v4019_v6 = vadd.f32 0.18741608, %v1794_v16 }
 0x1f3   : > { %v2553_v3 = vpop.eup %2552  ;;  %v1868_v1 = vmul.f32 2.1237322e-06, %v3991_v61  ;;  %v1445_v31 = vmul.f32 %v1444_v5, %v3551_v18  ;;  %v1519_v50 = vmul.f32 3.8918573e-05, %v3665_v9  ;;  %v4026_v35 = vmul.f32 %v1829_v11, %v3967_v14 }
 0x1f4   : > { %v1955_v36 = vmul.f32 %v1923_v13, %v4372_v27  ;;  %v1370_v39 = vmul.f32 %v2553_v3, %v3976_v48  ;;  %vm1374_vm8 = vweird.f32 %v3976_v48  ;;  %v1378_v53 = vand.u32 2147483647, %v3976_v48 }
 0x1f5   : > { %v2555_v25 = vpop.eup %2554  ;;  %v1446_v7 = vadd.f32 0.4994258, %v1445_v31  ;;  %v1483_v47 = vmul.f32 %v1482_v19, %v3559_v22  ;;  %v1520_v60 = vadd.f32 0.001143296, %v1519_v50  ;;  %v1380_v17 = vand.u32 2147483648, %v3976_v48 }
 0x1f6   : > { %2123 = vmatmul.f32.gmra.mxu3 %v1955_v36  ;;  %v1371_v10 = vsub.f32 1.0, %v1370_v39  ;;  %v1410_v8 = vmul.f32 %v2555_v25, %v3978_v28  ;;  %vm1414_vm9 = vweird.f32 %v3978_v28  ;;  %v1418_v2 = vand.u32 2147483647, %v3978_v28 }
 0x1f7   : > { %v1447_v42 = vmul.f32 %v1446_v7, %v3551_v18  ;;  %v1484_v15 = vadd.f32 0.112945676, %v1483_v47  ;;  %v1521_v20 = vmul.f32 %v1520_v60, %v3665_v9  ;;  %vm1375_vm10 = vweird.f32 %v2553_v3 }
 0x1f8   : > { %v1372_v56 = vmul.f32 %v2553_v3, %v1371_v10  ;;  %v1411_v59 = vsub.f32 1.0, %v1410_v8  ;;  %v1559_v51 = vmul.f32 3.8918573e-05, %v3671_v12  ;;  %v1420_v55 = vand.u32 2147483648, %v3978_v28  ;;  %vm1376_vm12 = vmor %vm1374_vm8, %vm1375_vm10 }
 0x1f9   : > { %v4040_v62 = vadd.f32 1.0, %v1447_v42  ;;  %v1485_v38 = vmul.f32 %v1484_v15, %v3559_v22  ;;  %v1522_v49 = vadd.f32 0.014752088, %v1521_v20  ;;  %vm1415_vm11 = vweird.f32 %v2555_v25 }
 0x1fa   : > { %v1373_v16 = vadd.f32 %v2553_v3, %v1372_v56  ;;  %v1412_v4 = vmul.f32 %v2555_v25, %v1411_v59  ;;  %v1560_v11 = vadd.f32 0.001143296, %v1559_v51  ;;  %vm1379_vm13 = vcmp.eq.f32.partialorder %v1378_v53, 8.507059e+37  ;;  %vm1416_vm14 = vmor %vm1414_vm9, %vm1415_vm11 }
 0x1fb   : > { %v1381_v18 = vor.u32 1.1754944e-38, %v1380_v17  ;;  %2556 = vrcp.f32 %v4040_v62  ;;  %v1599_v5 = vmul.f32 3.8918573e-05, %v3726_v63  ;;  %v1486_v31 = vadd.f32 0.4994258, %v1485_v38 }
 0x1fc   : > { %v1377_v13 = vsel %vm1376_vm12, %v2553_v3, %v1373_v16  ;;  %v1413_v19 = vadd.f32 %v2555_v25, %v1412_v4  ;;  %v1523_v50 = vmul.f32 %v1522_v49, %v3665_v9  ;;  %vm1419_vm15 = vcmp.eq.f32.partialorder %v1418_v2, 8.507059e+37 }
 0x1fd   : > { %v1382_v27 = vsel %vm1379_vm13, %v1381_v18, %v1377_v13  ;;  %v1421_v36 = vor.u32 1.1754944e-38, %v1420_v55  ;;  %v1561_v48 = vmul.f32 %v1560_v11, %v3671_v12  ;;  %v1487_v7 = vmul.f32 %v1486_v31, %v3559_v22 }
 0x1fe   : > { %v1383_v39 = vmul.f32 %v1382_v27, %v3685_v24  ;;  %v1417_v53 = vsel %vm1416_vm14, %v2555_v25, %v1413_v19  ;;  %v1524_v47 = vadd.f32 0.112945676, %v1523_v50  ;;  %v1600_v10 = vadd.f32 0.001143296, %v1599_v5  ;;  %v4374_v19 = vld [vmem:[#allocation32_spill] sm:$0xff] }
 0x1ff   : > { %v1422_v60 = vsel %vm1419_vm15, %v1421_v36, %v1417_v53  ;;  %v1562_v3 = vadd.f32 0.014752088, %v1561_v48  ;;  %v1639_v17 = vmul.f32 3.8918573e-05, %v3734_v57  ;;  %v4055_v28 = vadd.f32 1.0, %v1487_v7 }
 0x200   : > { %v2404_v8 = vclamps-f32 %v1383_v39, 1.0  ;;  %v1423_v42 = vmul.f32 %v1422_v60, %v3755_v58  ;;  %v1525_v2 = vmul.f32 %v1524_v47, %v3665_v9  ;;  %v4059_v20 = vadd.f32 1.1283791, %v4017_v26 }
 0x201   : > { %v2557_v15 = vpop.eup %2556  ;;  %v4061_v24 = vadd.f32 0.00028619796, %v1868_v1  ;;  %v1563_v22 = vmul.f32 %v1562_v3, %v3671_v12  ;;  %v1601_v25 = vmul.f32 %v1600_v10, %v3726_v63  ;;  %v1640_v55 = vadd.f32 0.001143296, %v1639_v17  ;;  %v4373_v1 = vld [vmem:[#allocation27_spill] sm:$0xff] }
 0x202   : > { %v1924_v56 = vadd.f32 1.0, %v2404_v8  ;;  %v2405_v59 = vclamps-f32 %v1423_v42, 1.0  ;;  %v1450_v51 = vmul.f32 %v2557_v15, %v4040_v62  ;;  %v4067_v58 = vadd.f32 0.0036580483, %v4026_v35 }
 0x203   : > { %v1460_v38 = vand.u32 2147483648, %v4040_v62  ;;  %2558 = vrcp.f32 %v4055_v28  ;;  %v1679_v26 = vmul.f32 3.8918573e-05, %v3790_v34  ;;  %v1526_v11 = vadd.f32 0.4994258, %v1525_v2 }
 0x204   : > { %v1956_v49 = vmul.f32 %v1924_v56, %v4373_v1  ;;  %v1925_v16 = vadd.f32 1.0, %v2405_v59  ;;  %v1451_v4 = vsub.f32 1.0, %v1450_v51  ;;  %vm1455_vm0 = vweird.f32 %v2557_v15 }
 0x205   : > { %v1458_v18 = vand.u32 2147483647, %v4040_v62  ;;  %v1564_v5 = vadd.f32 0.112945676, %v1563_v22  ;;  %v1602_v13 = vadd.f32 0.014752088, %v1601_v25  ;;  %v1527_v50 = vmul.f32 %v1526_v11, %v3665_v9 }
 0x206   : > { %2061 = vmatmul.f32.gmra.mxu2 %v1956_v49  ;;  %v1957_v35 = vmul.f32 %v1925_v16, %v4374_v19  ;;  %v1452_v31 = vmul.f32 %v2557_v15, %v1451_v4  ;;  %v1641_v27 = vmul.f32 %v1640_v55, %v3734_v57  ;;  %vm1454_vm1 = vweird.f32 %v4040_v62 }
 0x207   : > { %v1565_v36 = vmul.f32 %v1564_v5, %v3671_v12  ;;  %v1603_v48 = vmul.f32 %v1602_v13, %v3726_v63  ;;  %v1680_v39 = vadd.f32 0.001143296, %v1679_v26  ;;  %v1461_v7 = vor.u32 1.1754944e-38, %v1460_v38  ;;  %vm1456_vm2 = vmor %vm1454_vm1, %vm1455_vm0 }
 0x208   : > { %2126 = vmatmul.f32.gmra.mxu3 %v1957_v35  ;;  %v1453_v53 = vadd.f32 %v2557_v15, %v1452_v31  ;;  %v4080_v47 = vadd.f32 1.0, %v1527_v50  ;;  %v1719_v60 = vmul.f32 3.8918573e-05, %v3795_v41  ;;  %v1642_v17 = vadd.f32 0.014752088, %v1641_v27 }
 0x209   : > { %v2559_v3 = vpop.eup %2558  ;;  %v1566_v9 = vadd.f32 0.4994258, %v1565_v36  ;;  %v1604_v10 = vadd.f32 0.112945676, %v1603_v48  ;;  %v1681_v62 = vmul.f32 %v1680_v39, %v3790_v34  ;;  %vm1459_vm3 = vcmp.eq.f32.partialorder %v1458_v18, 8.507059e+37  ;;  %v4377_v48 = vld [vmem:[#allocation20_spill] sm:$0xff] }
 0x20a   : > { %v1457_v8 = vsel %vm1456_vm2, %v2557_v15, %v1453_v53  ;;  %v1490_v42 = vmul.f32 %v2559_v3, %v4055_v28  ;;  %2560 = vrcp.f32 %v4080_v47  ;;  %vm1494_vm4 = vweird.f32 %v4055_v28 }
 0x20b   : > { %v1462_v2 = vsel %vm1459_vm3, %v1461_v7, %v1457_v8  ;;  %v1498_v22 = vand.u32 2147483647, %v4055_v28  ;;  %v1500_v25 = vand.u32 2147483648, %v4055_v28  ;;  %v1567_v51 = vmul.f32 %v1566_v9, %v3671_v12 }
 0x20c   : > { %v1463_v56 = vmul.f32 %v1462_v2, %v3806_v52  ;;  %v1491_v59 = vsub.f32 1.0, %v1490_v42  ;;  %v1605_v55 = vmul.f32 %v1604_v10, %v3726_v63  ;;  %vm1495_vm5 = vweird.f32 %v2559_v3 }
 0x20d   : > { %v1643_v15 = vmul.f32 %v1642_v17, %v3734_v57  ;;  %v1682_v38 = vadd.f32 0.014752088, %v1681_v62  ;;  %v1720_v26 = vadd.f32 0.001143296, %v1719_v60  ;;  %v4094_v16 = vadd.f32 1.0, %v1567_v51  ;;  %vm1496_vm7 = vmor %vm1494_vm4, %vm1495_vm5 }
 0x20e   : > { %v2406_v1 = vclamps-f32 %v1463_v56, 1.0  ;;  %v1492_v49 = vmul.f32 %v2559_v3, %v1491_v59  ;;  %v1606_v4 = vadd.f32 0.4994258, %v1605_v55  ;;  %vm4096_vm6 = vcmp.eq.f32.partialorder %v1498_v22, 8.507059e+37 }
 0x20f   : > { %v1501_v52 = vor.u32 1.1754944e-38, %v1500_v25  ;;  %v1644_v18 = vadd.f32 0.112945676, %v1643_v15  ;;  %v1759_v12 = vmul.f32 3.8918573e-05, %v3863_v37  ;;  %2562 = vrcp.f32 %v4094_v16 }
 0x210   : > { %v2561_v5 = vpop.eup %2560  ;;  %v1926_v13 = vadd.f32 1.0, %v2406_v1  ;;  %v1493_v19 = vadd.f32 %v2559_v3, %v1492_v49  ;;  %v1683_v35 = vmul.f32 %v1682_v38, %v3790_v34  ;;  %v1538_v50 = vand.u32 2147483647, %v4080_v47 }
 0x211   : > { %v1530_v31 = vmul.f32 %v2561_v5, %v4080_v47  ;;  %v1540_v27 = vand.u32 2147483648, %v4080_v47  ;;  %v1721_v36 = vmul.f32 %v1720_v26, %v3795_v41  ;;  %v1607_v7 = vmul.f32 %v1606_v4, %v3726_v63 }
 0x212   : > { %v1958_v39 = vmul.f32 %v1926_v13, %v4377_v48  ;;  %v1497_v53 = vsel %vm1496_vm7, %v2559_v3, %v1493_v19  ;;  %v1645_v60 = vmul.f32 %v1644_v18, %v3734_v57  ;;  %vm1534_vm8 = vweird.f32 %v4080_v47 }
 0x213   : > { %v1502_v9 = vsel %vm4096_vm6, %v1501_v52, %v1497_v53  ;;  %v1531_v28 = vsub.f32 1.0, %v1530_v31  ;;  %v1760_v10 = vadd.f32 0.001143296, %v1759_v12  ;;  %v4117_v62 = vadd.f32 1.0, %v1607_v7  ;;  %v4380_v52 = vld [vmem:[#allocation28_spill] sm:$0xff] }
 0x214   : > { %2064 = vmatmul.f32.gmra.mxu2 %v1958_v39  ;;  %v1503_v17 = vmul.f32 %v1502_v9, %v3920_v46  ;;  %v1646_v8 = vadd.f32 0.4994258, %v1645_v60  ;;  %v1684_v42 = vadd.f32 0.112945676, %v1683_v35  ;;  %vm1535_vm9 = vweird.f32 %v2561_v5 }
 0x215   : > { %v1532_v2 = vmul.f32 %v2561_v5, %v1531_v28  ;;  %vm4119_vm10 = vcmp.eq.f32.partialorder %v1538_v50, 8.507059e+37  ;;  %v1722_v3 = vadd.f32 0.014752088, %v1721_v36  ;;  %v2563_v22 = vpop.eup %2562  ;;  %v1541_v56 = vor.u32 1.1754944e-38, %v1540_v27  ;;  %vm1536_vm12 = vmor %vm1534_vm8, %vm1535_vm9 }
 0x216   : > { %v2407_v25 = vclamps-f32 %v1503_v17, 1.0  ;;  %vm1574_vm11 = vweird.f32 %v4094_v16  ;;  %2564 = vrcp.f32 %v4117_v62  ;;  %v1570_v46 = vmul.f32 %v2563_v22, %v4094_v16 }
 0x217   : > { %v1533_v59 = vadd.f32 %v2561_v5, %v1532_v2  ;;  %v1578_v51 = vand.u32 2147483647, %v4094_v16  ;;  %v1761_v55 = vmul.f32 %v1760_v10, %v3863_v37  ;;  %v1580_v38 = vand.u32 2147483648, %v4094_v16 }
 0x218   : > { %v1927_v15 = vadd.f32 1.0, %v2407_v25  ;;  %v1647_v26 = vmul.f32 %v1646_v8, %v3734_v57  ;;  %v1685_v1 = vmul.f32 %v1684_v42, %v3790_v34  ;;  %v1571_v4 = vsub.f32 1.0, %v1570_v46 }
 0x219   : > { %v1537_v49 = vsel %vm1536_vm12, %v2561_v5, %v1533_v59  ;;  %vm1575_vm13 = vweird.f32 %v2563_v22  ;;  %v1723_v11 = vmul.f32 %v1722_v3, %v3795_v41  ;;  %v1762_v57 = vadd.f32 0.014752088, %v1761_v55  ;;  %v4383_v3 = vld [vmem:[#allocation21_spill] sm:$0xff] }
 0x21a   : > { %v1959_v18 = vmul.f32 %v1927_v15, %v4380_v52  ;;  %v1542_v12 = vsel %vm4119_vm10, %v1541_v56, %v1537_v49  ;;  %v4137_v13 = vadd.f32 1.0, %v1647_v26  ;;  %v1686_v47 = vadd.f32 0.4994258, %v1685_v1  ;;  %vm1576_vm15 = vmor %vm1574_vm11, %vm1575_vm13 }
 0x21b   : > { %v1543_v19 = vmul.f32 %v1542_v12, %v3988_v0  ;;  %v1572_v35 = vmul.f32 %v2563_v22, %v1571_v4  ;;  %v1724_v31 = vadd.f32 0.112945676, %v1723_v11  ;;  %vm4140_vm14 = vcmp.eq.f32.partialorder %v1578_v51, 8.507059e+37 }
 0x21c   : > { %v2565_v50 = vpop.eup %2564  ;;  %2129 = vmatmul.f32.gmra.mxu3 %v1959_v18  ;;  %v1581_v27 = vor.u32 1.1754944e-38, %v1580_v38  ;;  %2566 = vrcp.f32 %v4137_v13  ;;  %v1799_v36 = vmul.f32 3.8918573e-05, %v3872_v32  ;;  %v1618_v0 = vand.u32 2147483647, %v4117_v62 }
 0x21d   : > { %v2408_v48 = vclamps-f32 %v1543_v19, 1.0  ;;  %v1573_v39 = vadd.f32 %v2563_v22, %v1572_v35  ;;  %v1610_v53 = vmul.f32 %v2565_v50, %v4117_v62  ;;  %vm1615_vm0 = vweird.f32 %v2565_v50  ;;  %v4386_v35 = vld [vmem:[#allocation22_spill] sm:$0xff] }
 0x21e   : > { %v1620_v7 = vand.u32 2147483648, %v4117_v62  ;;  %v1687_v60 = vmul.f32 %v1686_v47, %v3790_v34  ;;  %v1725_v9 = vmul.f32 %v1724_v31, %v3795_v41  ;;  %v1763_v8 = vmul.f32 %v1762_v57, %v3863_v37 }
 0x21f   : > { %v1928_v28 = vadd.f32 1.0, %v2408_v48  ;;  %v1577_v10 = vsel %vm1576_vm15, %v2563_v22, %v1573_v39  ;;  %v1611_v17 = vsub.f32 1.0, %v1610_v53  ;;  %v1800_v16 = vadd.f32 0.001143296, %v1799_v36 }
 0x220   : > { %v1582_v42 = vsel %vm4140_vm14, %v1581_v27, %v1577_v10  ;;  %v4157_v2 = vadd.f32 1.0, %v1687_v60  ;;  %v1726_v63 = vadd.f32 0.4994258, %v1725_v9  ;;  %v1764_v34 = vadd.f32 0.112945676, %v1763_v8 }
 0x221   : > { %v1960_v25 = vmul.f32 %v1928_v28, %v4383_v3  ;;  %v1583_v56 = vmul.f32 %v1582_v42, %v3996_v29  ;;  %v1612_v59 = vmul.f32 %v2565_v50, %v1611_v17  ;;  %vm1614_vm1 = vweird.f32 %v4117_v62 }
 0x222   : > { %v2567_v46 = vpop.eup %2566  ;;  %vm4162_vm2 = vcmp.eq.f32.partialorder %v1618_v0, 8.507059e+37  ;;  %v1621_v51 = vor.u32 1.1754944e-38, %v1620_v7  ;;  %2568 = vrcp.f32 %v4157_v2  ;;  %v1658_v26 = vand.u32 2147483647, %v4137_v13  ;;  %vm1616_vm3 = vmor %vm1614_vm1, %vm1615_vm0 }
 0x223   : > { %2067 = vmatmul.f32.gmra.mxu2 %v1960_v25  ;;  %v2409_v55 = vclamps-f32 %v1583_v56, 1.0  ;;  %v1613_v15 = vadd.f32 %v2565_v50, %v1612_v59  ;;  %v1650_v38 = vmul.f32 %v2567_v46, %v4137_v13  ;;  %vm1655_vm4 = vweird.f32 %v2567_v46 }
 0x224   : > { %v1660_v29 = vand.u32 2147483648, %v4137_v13  ;;  %v1727_v62 = vmul.f32 %v1726_v63, %v3795_v41  ;;  %v1765_v1 = vmul.f32 %v1764_v34, %v3863_v37  ;;  %v1801_v52 = vmul.f32 %v1800_v16, %v3872_v32  ;;  %v4389_v16 = vld [vmem:[#allocation24_spill] sm:$0xff] }
 0x225   : > { %v1929_v49 = vadd.f32 1.0, %v2409_v55  ;;  %v1617_v4 = vsel %vm1616_vm3, %v2565_v50, %v1613_v15  ;;  %v1651_v11 = vsub.f32 1.0, %v1650_v38  ;;  %v1839_v19 = vmul.f32 3.8918573e-05, %v3967_v14 }
 0x226   : > { %v1622_v18 = vsel %vm4162_vm2, %v1621_v51, %v1617_v4  ;;  %v4176_v12 = vadd.f32 1.0, %v1727_v62  ;;  %v1766_v47 = vadd.f32 0.4994258, %v1765_v1  ;;  %v1802_v5 = vadd.f32 0.014752088, %v1801_v52  ;;  %v4392_v52 = vld [vmem:[#allocation36_spill] sm:$0xff] }
 0x227   : > { %v1961_v31 = vmul.f32 %v1929_v49, %v4386_v35  ;;  %v1623_v57 = vmul.f32 %v1622_v18, %v4003_v45  ;;  %v1652_v41 = vmul.f32 %v2567_v46, %v1651_v11  ;;  %vm1654_vm5 = vweird.f32 %v4137_v13 }
 0x228   : > { %v2569_v27 = vpop.eup %2568  ;;  %vm4182_vm6 = vcmp.eq.f32.partialorder %v1658_v26, 8.507059e+37  ;;  %v1661_v36 = vor.u32 1.1754944e-38, %v1660_v29  ;;  %2570 = vrcp.f32 %v4176_v12  ;;  %v1698_v0 = vand.u32 2147483647, %v4157_v2  ;;  %vm1656_vm7 = vmor %vm1654_vm5, %vm1655_vm4 }
 0x229   : > { %2132 = vmatmul.f32.gmra.mxu3 %v1961_v31  ;;  %v2410_v48 = vclamps-f32 %v1623_v57, 1.0  ;;  %v1653_v39 = vadd.f32 %v2567_v46, %v1652_v41  ;;  %v1690_v53 = vmul.f32 %v2569_v27, %v4157_v2  ;;  %vm1695_vm8 = vweird.f32 %v2569_v27 }
 0x22a   : > { %v1700_v45 = vand.u32 2147483648, %v4157_v2  ;;  %v1767_v13 = vmul.f32 %v1766_v47, %v3863_v37  ;;  %v1803_v7 = vmul.f32 %v1802_v5, %v3872_v32  ;;  %v1840_v10 = vadd.f32 0.001143296, %v1839_v19 }
 0x22b   : > { %v1930_v60 = vadd.f32 1.0, %v2410_v48  ;;  %v1657_v9 = vsel %vm1656_vm7, %v2567_v46, %v1653_v39  ;;  %v1691_v28 = vsub.f32 1.0, %v1690_v53  ;;  %v1879_v63 = vmul.f32 3.8918573e-05, %v3991_v61  ;;  %v4394_v46 = vld [vmem:[#allocation34_spill] sm:$0xff] }
 0x22c   : > { %v1662_v17 = vsel %vm4182_vm6, %v1661_v36, %v1657_v9  ;;  %v4195_v8 = vadd.f32 1.0, %v1767_v13  ;;  %v1804_v42 = vadd.f32 0.112945676, %v1803_v7  ;;  %v1841_v37 = vmul.f32 %v1840_v10, %v3967_v14 }
 0x22d   : > { %v1962_v3 = vmul.f32 %v1930_v60, %v4389_v16  ;;  %v1663_v25 = vmul.f32 %v1662_v17, %v4007_v43  ;;  %v1692_v56 = vmul.f32 %v2569_v27, %v1691_v28  ;;  %v1870_v34 = vmul.f32 %v4061_v24, %v3991_v61  ;;  %v4393_v17 = vld [vmem:[#allocation23_spill] sm:$0xff] }
 0x22e   : > { %v2571_v59 = vpop.eup %2570  ;;  %vm1694_vm9 = vweird.f32 %v4157_v2  ;;  %vm4204_vm10 = vcmp.eq.f32.partialorder %v1698_v0, 8.507059e+37  ;;  %2572 = vrcp.f32 %v4195_v8  ;;  %v1701_v55 = vor.u32 1.1754944e-38, %v1700_v45 }
 0x22f   : > { %2070 = vmatmul.f32.gmra.mxu2 %v1962_v3  ;;  %v2411_v22 = vclamps-f32 %v1663_v25, 1.0  ;;  %v1693_v51 = vadd.f32 %v2569_v27, %v1692_v56  ;;  %v1730_v43 = vmul.f32 %v2571_v59, %v4176_v12  ;;  %vm1696_vm11 = vmor %vm1694_vm9, %vm1695_vm8  ;;  %v1738_v15 = vand.u32 2147483647, %v4176_v12 }
 0x230   : > { %v1740_v24 = vand.u32 2147483648, %v4176_v12  ;;  %v1805_v2 = vmul.f32 %v1804_v42, %v3872_v32  ;;  %v1842_v38 = vadd.f32 0.014752088, %v1841_v37  ;;  %v1880_v1 = vadd.f32 0.001143296, %v1879_v63 }
 0x231   : > { %v1931_v26 = vadd.f32 1.0, %v2411_v22  ;;  %v1697_v29 = vsel %vm1696_vm11, %v2569_v27, %v1693_v51  ;;  %v1731_v62 = vsub.f32 1.0, %v1730_v43  ;;  %vm1735_vm12 = vweird.f32 %v2571_v59 }
 0x232   : > { %v1702_v49 = vsel %vm4204_vm10, %v1701_v55, %v1697_v29  ;;  %v1806_v4 = vadd.f32 0.4994258, %v1805_v2  ;;  %v1843_v11 = vmul.f32 %v1842_v38, %v3967_v14  ;;  %v1881_v35 = vmul.f32 %v1880_v1, %v3991_v61 }
 0x233   : > { %v1963_v18 = vmul.f32 %v1931_v26, %v4392_v52  ;;  %v1703_v47 = vmul.f32 %v1702_v49, %v4011_v33  ;;  %v1732_v19 = vmul.f32 %v2571_v59, %v1731_v62  ;;  %v1832_v57 = vmul.f32 %v4067_v58, %v3967_v14  ;;  %v4395_v26 = vld [vmem:[#allocation25_spill] sm:$0xff] }
 0x234   : > { %v2573_v31 = vpop.eup %2572  ;;  %v1871_v41 = vadd.f32 0.0036580483, %v1870_v34  ;;  %v1807_v5 = vmul.f32 %v1806_v4, %v3872_v32  ;;  %v1844_v27 = vadd.f32 0.112945676, %v1843_v11  ;;  %vm1734_vm13 = vweird.f32 %v4176_v12  ;;  %v1970_v49 = vld [vmem:[#allocation2 + $0x30] sm:$0xff]  ;;  %v2100_v4 = vpop.f32.mrf.mxu3 }
 0x235   : > { %2135 = vmatmul.f32.gmra.mxu3 %v1963_v18  ;;  %v2412_v50 = vclamps-f32 %v1703_v47, 1.0  ;;  %v1733_v36 = vadd.f32 %v2571_v59, %v1732_v19  ;;  %v1770_v48 = vmul.f32 %v2573_v31, %v4195_v8  ;;  %vm1736_vm14 = vmor %vm1734_vm13, %vm1735_vm12  ;;  %v1741_v33 = vor.u32 1.1754944e-38, %v1740_v24 }
 0x236   : > { %v4226_v39 = vadd.f32 1.0, %v1807_v5  ;;  %v1845_v53 = vmul.f32 %v1844_v27, %v3967_v14  ;;  %v1882_v0 = vadd.f32 0.014752088, %v1881_v35  ;;  %vm1739_vm15 = vcmp.eq.f32.partialorder %v1738_v15, 8.507059e+37 }
 0x237   : > { %v1932_v58 = vadd.f32 1.0, %v2412_v50  ;;  %v1737_v45 = vsel %vm1736_vm14, %v2571_v59, %v1733_v36  ;;  %v1771_v13 = vsub.f32 1.0, %v1770_v48  ;;  %v1778_v60 = vand.u32 2147483647, %v4195_v8 }
 0x238   : > { %v1742_v7 = vsel %vm1739_vm15, %v1741_v33, %v1737_v45  ;;  %v1780_v9 = vand.u32 2147483648, %v4195_v8  ;;  %2574 = vrcp.f32 %v4226_v39  ;;  %vm1775_vm0 = vweird.f32 %v2573_v31 }
 0x239   : > { %v1964_v12 = vmul.f32 %v1932_v58, %v3999_v40  ;;  %v1743_v28 = vmul.f32 %v1742_v7, %v4014_v23  ;;  %v1772_v10 = vmul.f32 %v2573_v31, %v1771_v13  ;;  %v589_v42 = vmul.f32 0.5, %v4393_v17 }
 0x23a   : > { %v1833_v63 = vadd.f32 0.05243302, %v1832_v57  ;;  %v1846_v16 = vadd.f32 0.4994258, %v1845_v53  ;;  %v1883_v3 = vmul.f32 %v1882_v0, %v3991_v61  ;;  %v1796_v25 = vmul.f32 %v4019_v6, %v3872_v32  ;;  %v4396_v0 = vld [vmem:[#allocation35_spill] sm:$0xff] }
 0x23b   : > { %2073 = vmatmul.f32.gmra.mxu2 %v1964_v12  ;;  %v2413_v56 = vclamps-f32 %v1743_v28, 1.0  ;;  %v1773_v37 = vadd.f32 %v2573_v31, %v1772_v10  ;;  %vm1774_vm1 = vweird.f32 %v4195_v8  ;;  %v1872_v40 = vmul.f32 %v1871_v41, %v3991_v61  ;;  %v1971_v12 = vld [vmem:[#allocation2] sm:$0xff] }
 0x23c   : > { %vm1776_vm2 = vmor %vm1774_vm1, %vm1775_vm0  ;;  %v1781_v23 = vor.u32 1.1754944e-38, %v1780_v9  ;;  %v1847_v59 = vmul.f32 %v1846_v16, %v3967_v14  ;;  %v1884_v34 = vadd.f32 0.112945676, %v1883_v3  ;;  %v1758_v22 = vmul.f32 %v4059_v20, %v4394_v46  ;;  %v2035_v20 = vpop.f32.mrf.mxu2  ;;  %v2103_v28 = vpop.f32.mrf.mxu3 }
 0x23d   : > { %v1933_v51 = vadd.f32 1.0, %v2413_v56  ;;  %v1777_v55 = vsel %vm1776_vm2, %v2573_v31, %v1773_v37  ;;  %vm1779_vm3 = vcmp.eq.f32.partialorder %v1778_v60, 8.507059e+37  ;;  %v1834_v32 = vmul.f32 %v1833_v63, %v3967_v14 }
 0x23e   : > { %v2575_v43 = vpop.eup %2574  ;;  %v1782_v6 = vsel %vm1779_vm3, %v1781_v23, %v1777_v55  ;;  %v4244_v15 = vadd.f32 1.0, %v1847_v59  ;;  %v1885_v8 = vmul.f32 %v1884_v34, %v3991_v61  ;;  %v590_v29 = vmul.f32 0.5, %v4395_v26  ;;  %v4397_v23 = vld [vmem:[#allocation33_spill] sm:$0xff] }
 0x23f   : > { %v1965_v24 = vmul.f32 %v1933_v51, %v589_v42  ;;  %v1783_v2 = vmul.f32 %v1782_v6, %v1758_v22  ;;  %v1810_v38 = vmul.f32 %v2575_v43, %v4226_v39  ;;  %v1797_v62 = vadd.f32 1.1283791, %v1796_v25 }
 0x240   : > { %v1873_v1 = vadd.f32 0.05243302, %v1872_v40  ;;  %2576 = vrcp.f32 %v4244_v15  ;;  %v1886_v18 = vadd.f32 0.4994258, %v1885_v8  ;;  %v2101_v47 = vadd.f32 %v2100_v4, %v2035_v20 }
 0x241   : > { %2138 = vmatmul.f32.gmra.mxu3 %v1965_v24  ;;  %v2414_v11 = vclamps-f32 %v1783_v2, 1.0  ;;  %v1811_v52 = vsub.f32 1.0, %v1810_v38  ;;  %v1835_v19 = vadd.f32 0.18741608, %v1834_v32  ;;  %vm1815_vm4 = vweird.f32 %v2575_v43  ;;  %v1972_v38 = vld [vmem:[#allocation2 + $0x58] sm:$0xff] }
 0x242   : > { %v1818_v35 = vand.u32 2147483647, %v4226_v39  ;;  %v1820_v31 = vand.u32 2147483648, %v4226_v39  ;;  %v1887_v5 = vmul.f32 %v1886_v18, %v3991_v61  ;;  %v2148_v27 = vadd.f32 %v2101_v47, %v1970_v49 }
 0x243   : > { %v1934_v57 = vadd.f32 1.0, %v2414_v11  ;;  %v1812_v41 = vmul.f32 %v2575_v43, %v1811_v52  ;;  %v1874_v50 = vmul.f32 %v1873_v1, %v3991_v61  ;;  %vm1814_vm5 = vweird.f32 %v4226_v39 }
 0x244   : > { %v4255_v33 = vadd.f32 1.0, %v1887_v5  ;;  %2164 = vst [vmem:[#allocation2 + $0x30] sm:$0xff] %v2148_v27  ;;  %v1798_v58 = vmul.f32 %v1797_v62, %v4396_v0  ;;  %v1836_v45 = vmul.f32 %v1835_v19, %v3967_v14  ;;  %vm1816_vm6 = vmor %vm1814_vm5, %vm1815_vm4  ;;  %v1821_v13 = vor.u32 1.1754944e-38, %v1820_v31  ;;  %v2038_v39 = vpop.f32.mrf.mxu2  ;;  %v2106_v26 = vpop.f32.mrf.mxu3  ;;  %v1973_v5 = vld [vmem:[#allocation2 + $0x18] sm:$0xff] }
 0x245   : > { %v1966_v36 = vmul.f32 %v1934_v57, %v590_v29  ;;  %v1813_v48 = vadd.f32 %v2575_v43, %v1812_v41  ;;  %vm1819_vm7 = vcmp.eq.f32.partialorder %v1818_v35, 8.507059e+37  ;;  %v1875_v10 = vadd.f32 0.18741608, %v1874_v50 }
 0x246   : > { %v2577_v53 = vpop.eup %2576  ;;  %2578 = vrcp.f32 %v4255_v33  ;;  %v2104_v63 = vadd.f32 %v2103_v28, %v2038_v39  ;;  %v1837_v16 = vadd.f32 1.1283791, %v1836_v45  ;;  %v1858_v14 = vand.u32 2147483647, %v4244_v15 }
 0x247   : > { %2076 = vmatmul.f32.gmra.mxu2 %v1966_v36  ;;  %v1817_v7 = vsel %vm1816_vm6, %v2575_v43, %v1813_v48  ;;  %v1850_v60 = vmul.f32 %v2577_v53, %v4244_v15  ;;  %v1860_v3 = vand.u32 2147483648, %v4244_v15  ;;  %vm1855_vm8 = vweird.f32 %v2577_v53 }
 0x248   : > { %v1822_v9 = vsel %vm1819_vm7, %v1821_v13, %v1817_v7  ;;  %v2149_v37 = vadd.f32 %v2104_v63, %v1971_v12  ;;  %v591_v59 = vmul.f32 0.5, %v4397_v23  ;;  %vm1854_vm9 = vweird.f32 %v4244_v15 }
 0x249   : > { %v1823_v17 = vmul.f32 %v1822_v9, %v1798_v58  ;;  %v1851_v42 = vsub.f32 1.0, %v1850_v60  ;;  %v1876_v22 = vmul.f32 %v1875_v10, %v3991_v61  ;;  %vm1856_vm10 = vmor %vm1854_vm9, %vm1855_vm8  ;;  %v1861_v51 = vor.u32 1.1754944e-38, %v1860_v3  ;;  %v1975_v60 = vld [vmem:[#allocation2 + $0x68] sm:$0xff] }
 0x24a   : > { %2165 = vst [vmem:[#allocation2] sm:$0xff] %v2149_v37  ;;  %v1838_v43 = vmul.f32 %v1837_v16, %v3935_v44  ;;  %vm1859_vm11 = vcmp.eq.f32.partialorder %v1858_v14, 8.507059e+37  ;;  %v1900_v15 = vand.u32 2147483648, %v4255_v33  ;;  %v1898_v20 = vand.u32 2147483647, %v4255_v33  ;;  %v1976_v10 = vld [vmem:[#allocation2 + $0x8] sm:$0xff] }
 0x24b   : > { %v2415_v25 = vclamps-f32 %v1823_v17, 1.0  ;;  %v1852_v56 = vmul.f32 %v2577_v53, %v1851_v42  ;;  %v1877_v61 = vadd.f32 1.1283791, %v1876_v22  ;;  %vm1894_vm13 = vweird.f32 %v4255_v33  ;;  %v1977_v16 = vld [vmem:[#allocation2 + $0x48] sm:$0xff]  ;;  %v1978_v37 = vld [vmem:[#allocation2 + $0x40] sm:$0xff] }
 0x24c   : > { %v2579_v40 = vpop.eup %2578  ;;  %v2041_v2 = vpop.f32.mrf.mxu2  ;;  %v592_v11 = vmul.f32 0.5, %v3916_v21  ;;  %v1901_v18 = vor.u32 1.1754944e-38, %v1900_v15  ;;  %vm1899_vm15 = vcmp.eq.f32.partialorder %v1898_v20, 8.507059e+37  ;;  %v593_v21 = vmul.f32 0.5, %v3945_v30 }
 0x24d   : > { %v1935_v34 = vadd.f32 1.0, %v2415_v25  ;;  %v1853_v46 = vadd.f32 %v2577_v53, %v1852_v56  ;;  %v1890_v55 = vmul.f32 %v2579_v40, %v4255_v33  ;;  %v2107_v62 = vadd.f32 %v2106_v26, %v2041_v2  ;;  %v2109_v27 = vpop.f32.mrf.mxu3 }
 0x24e   : > { %vm1895_vm12 = vweird.f32 %v2579_v40  ;;  %v1878_v47 = vmul.f32 %v1877_v61, %v3962_v54  ;;  %v1974_v54 = vld [vmem:[#allocation2 + $0x50] sm:$0xff]  ;;  %v1982_v61 = vld [vmem:[#allocation2 + $0x60] sm:$0xff] }
 0x24f   : > { %v1967_v32 = vmul.f32 %v1935_v34, %v591_v59  ;;  %v1857_v6 = vsel %vm1856_vm10, %v2577_v53, %v1853_v46  ;;  %v1891_v24 = vsub.f32 1.0, %v1890_v55  ;;  %v2150_v44 = vadd.f32 %v2107_v62, %v1972_v38  ;;  %vm1896_vm14 = vmor %vm1894_vm13, %vm1895_vm12  ;;  %v1979_v46 = vld [vmem:[#allocation2 + $0x20] sm:$0xff]  ;;  %v1981_v38 = vld [vmem:[#allocation2 + $0x38] sm:$0xff] }
 0x250   : > { %v1862_v8 = vsel %vm1859_vm11, %v1861_v51, %v1857_v6 }
 0x251   : > { %2141 = vmatmul.f32.gmra.mxu3 %v1967_v32  ;;  %v1863_v29 = vmul.f32 %v1862_v8, %v1838_v43  ;;  %v1892_v1 = vmul.f32 %v2579_v40, %v1891_v24  ;;  %2166 = vst [vmem:[#allocation2 + $0x58] sm:$0xff] %v2150_v44  ;;  %v1980_v32 = vld [vmem:[#allocation2 + $0x10] sm:$0xff] }
 0x253   : > { %v2416_v49 = vclamps-f32 %v1863_v29, 1.0  ;;  %v1893_v4 = vadd.f32 %v2579_v40, %v1892_v1 }
 0x254   : > { %v2044_v41 = vpop.f32.mrf.mxu2 }
 0x255   : > { %v1936_v52 = vadd.f32 1.0, %v2416_v49  ;;  %v1897_v19 = vsel %vm1896_vm14, %v2579_v40, %v1893_v4  ;;  %v2110_v50 = vadd.f32 %v2109_v27, %v2044_v41  ;;  %v2112_v58 = vpop.f32.mrf.mxu3  ;;  %v1983_v4 = vld [vmem:[#allocation2 + $0x70] sm:$0xff] }
 0x256   : > { %v1902_v31 = vsel %vm1899_vm15, %v1901_v18, %v1897_v19  ;;  %v1984_v19 = vld [vmem:[#allocation2 + $0x78] sm:$0xff] }
 0x257   : > { %v1968_v35 = vmul.f32 %v1936_v52, %v592_v11  ;;  %v1903_v57 = vmul.f32 %v1902_v31, %v1878_v47  ;;  %v2151_v48 = vadd.f32 %v2110_v50, %v1973_v5  ;;  %v1985_v5 = vld [vmem:[#allocation2 + $0x28] sm:$0xff] }
 0x259   : > { %2079 = vmatmul.f32.gmra.mxu2 %v1968_v35  ;;  %v2417_v36 = vclamps-f32 %v1903_v57, 1.0  ;;  %2167 = vst [vmem:[#allocation2 + $0x18] sm:$0xff] %v2151_v48 }
 0x25b   : > { %v1937_v33 = vadd.f32 1.0, %v2417_v36 }
 0x25c   : > { %v2047_v0 = vpop.f32.mrf.mxu2 }
 0x25d   : > { %v1969_v53 = vmul.f32 %v1937_v33, %v593_v21  ;;  %v2113_v45 = vadd.f32 %v2112_v58, %v2047_v0  ;;  %v2115_v9 = vpop.f32.mrf.mxu3 }
 0x25f   : > { %2144 = vmatmul.f32.gmra.mxu3 %v1969_v53  ;;  %v2152_v13 = vadd.f32 %v2113_v45, %v1974_v54 }
 0x261   : > { %2168 = vst [vmem:[#allocation2 + $0x50] sm:$0xff] %v2152_v13 }
 0x264   : > { %v2050_v7 = vpop.f32.mrf.mxu2 }
 0x265   : > { %v2116_v39 = vadd.f32 %v2115_v9, %v2050_v7  ;;  %v2118_v17 = vpop.f32.mrf.mxu3 }
 0x267   : > { %v2153_v12 = vadd.f32 %v2116_v39, %v1975_v60 }
 0x269   : > { %2169 = vst [vmem:[#allocation2 + $0x68] sm:$0xff] %v2153_v12 }
 0x26c   : > { %v2053_v28 = vpop.f32.mrf.mxu2 }
 0x26d   : > { %v2119_v30 = vadd.f32 %v2118_v17, %v2053_v28  ;;  %v2121_v14 = vpop.f32.mrf.mxu3 }
 0x26f   : > { %v2154_v42 = vadd.f32 %v2119_v30, %v1976_v10 }
 0x271   : > { %2170 = vst [vmem:[#allocation2 + $0x8] sm:$0xff] %v2154_v42 }
 0x274   : > { %v2056_v63 = vpop.f32.mrf.mxu2 }
 0x275   : > { %v2122_v3 = vadd.f32 %v2121_v14, %v2056_v63 }
 0x277   : > { %v2155_v25 = vadd.f32 %v2122_v3, %v1977_v16 }
 0x279   : > { %2171 = vst [vmem:[#allocation2 + $0x48] sm:$0xff] %v2155_v25  ;;  %v2124_v40 = vpop.f32.mrf.mxu3 }
 0x27c   : > { %v2059_v56 = vpop.f32.mrf.mxu2 }
 0x27d   : > { %v2125_v23 = vadd.f32 %v2124_v40, %v2059_v56 }
 0x27f   : > { %v2156_v59 = vadd.f32 %v2125_v23, %v1978_v37 }
 0x281   : > { %2172 = vst [vmem:[#allocation2 + $0x40] sm:$0xff] %v2156_v59 }
 0x289   : > { %v2062_v34 = vpop.f32.mrf.mxu2 }
 0x28b   : > { %v2127_v22 = vpop.f32.mrf.mxu3 }
 0x28c   : > { %v2128_v51 = vadd.f32 %v2127_v22, %v2062_v34 }
 0x28e   : > { %v2157_v55 = vadd.f32 %v2128_v51, %v1979_v46 }
 0x290   : > { %2173 = vst [vmem:[#allocation2 + $0x20] sm:$0xff] %v2157_v55 }
 0x297   : > { %v2065_v43 = vpop.f32.mrf.mxu2 }
 0x29f   : > { %v2130_v6 = vpop.f32.mrf.mxu3 }
 0x2a0   : > { %v2131_v8 = vadd.f32 %v2130_v6, %v2065_v43 }
 0x2a2   : > { %v2158_v24 = vadd.f32 %v2131_v8, %v1980_v32 }
 0x2a4   : > { %2174 = vst [vmem:[#allocation2 + $0x10] sm:$0xff] %v2158_v24 }
 0x2a6   : > { %v2068_v2 = vpop.f32.mrf.mxu2 }
 0x2ac   : > { %v2133_v26 = vpop.f32.mrf.mxu3 }
 0x2ad   : > { %v2134_v29 = vadd.f32 %v2133_v26, %v2068_v2 }
 0x2af   : > { %v2159_v15 = vadd.f32 %v2134_v29, %v1981_v38 }
 0x2b1   : > { %2175 = vst [vmem:[#allocation2 + $0x38] sm:$0xff] %v2159_v15 }
 0x2b2   : > { %v2071_v62 = vpop.f32.mrf.mxu2 }
 0x2b8   : > { %v2136_v1 = vpop.f32.mrf.mxu3 }
 0x2b9   : > { %v2137_v20 = vadd.f32 %v2136_v1, %v2071_v62 }
 0x2bb   : > { %v2160_v49 = vadd.f32 %v2137_v20, %v1982_v61 }
 0x2bd   : > { %2176 = vst [vmem:[#allocation2 + $0x60] sm:$0xff] %v2160_v49 }
 0x2be   : > { %v2074_v44 = vpop.f32.mrf.mxu2 }
 0x2c4   : > { %v2139_v11 = vpop.f32.mrf.mxu3 }
 0x2c5   : > { %v2140_v52 = vadd.f32 %v2139_v11, %v2074_v44 }
 0x2c7   : > { %v2161_v18 = vadd.f32 %v2140_v52, %v1983_v4 }
 0x2c9   : > { %2177 = vst [vmem:[#allocation2 + $0x70] sm:$0xff] %v2161_v18 }
 0x2ca   : > { %v2077_v47 = vpop.f32.mrf.mxu2 }
 0x2d4   : > { %v2142_v35 = vpop.f32.mrf.mxu3 }
 0x2d5   : > { %v2143_v31 = vadd.f32 %v2142_v35, %v2077_v47 }
 0x2d7   : > { %v2162_v57 = vadd.f32 %v2143_v31, %v1984_v19 }
 0x2d9   : > { %2178 = vst [vmem:[#allocation2 + $0x78] sm:$0xff] %v2162_v57 }
 0x2dc   : > { %v2080_v41 = vpop.f32.mrf.mxu2 }
 0x2e2   : > { %v2145_v27 = vpop.f32.mrf.mxu3 }
 0x2e3   : > { %v2146_v50 = vadd.f32 %v2145_v27, %v2080_v41  ;;  %2183 = sbr.rel (%p2418_p2) target bundleno = 763 (0x2fb), region = 64 }
 0x2e5   : > { %v2163_v36 = vadd.f32 %v2146_v50, %v1985_v5 }
 0x2e7   : > { %2179 = vst [vmem:[#allocation2 + $0x28] sm:$0xff] %v2163_v36 }
 0x2e8   : > { %v2184_v48 = vld [vmem:[#allocation2 + $0x30] sm:$0xff]  ;;  %v2580_v21 = vld [vmem:[%s4305_s4] ss:$0 sm:$0xff]  ;;  %v2186_v53 = vld [vmem:[#allocation2 + $0x58] sm:$0xff] }
 0x2e9   : > { %v2185_v33 = vld [vmem:[#allocation2] sm:$0xff]  ;;  %v2187_v0 = vld [vmem:[#allocation2 + $0x18] sm:$0xff]  ;;  %v2204_v54 = vadd.f32 %v2580_v21, %v2184_v48  ;;  %v2206_v45 = vadd.f32 %v2580_v21, %v2186_v53  ;;  %v2188_v13 = vld [vmem:[#allocation2 + $0x50] sm:$0xff] }
 0x2ea   : > { %v2205_v58 = vadd.f32 %v2580_v21, %v2185_v33  ;;  %v2189_v7 = vld [vmem:[#allocation2 + $0x68] sm:$0xff]  ;;  %v2207_v60 = vadd.f32 %v2580_v21, %v2187_v0  ;;  %v2208_v39 = vadd.f32 %v2580_v21, %v2188_v13  ;;  %v2192_v10 = vld [vmem:[#allocation2 + $0x40] sm:$0xff]  ;;  %v2194_v63 = vld [vmem:[#allocation2 + $0x10] sm:$0xff] }
 0x2eb   : > { %v2190_v9 = vld [vmem:[#allocation2 + $0x8] sm:$0xff]  ;;  %2220 = vst [vmem:[#allocation11] sm:$0xff] %v2204_v54  ;;  %v2209_v28 = vadd.f32 %v2580_v21, %v2189_v7  ;;  %v2193_v30 = vld [vmem:[#allocation2 + $0x20] sm:$0xff]  ;;  %v2212_v16 = vadd.f32 %v2580_v21, %v2192_v10  ;;  %v2195_v14 = vld [vmem:[#allocation2 + $0x38] sm:$0xff]  ;;  %v2214_v56 = vadd.f32 %v2580_v21, %v2194_v63 }
 0x2ec   : > { %v2191_v12 = vld [vmem:[#allocation2 + $0x48] sm:$0xff]  ;;  %2221 = vst [vmem:[#allocation11 + $0x8] sm:$0xff] %v2205_v58  ;;  %v2210_v17 = vadd.f32 %v2580_v21, %v2190_v9  ;;  %v2213_v3 = vadd.f32 %v2580_v21, %v2193_v30  ;;  %v2196_v25 = vld [vmem:[#allocation2 + $0x60] sm:$0xff]  ;;  %v2197_v37 = vld [vmem:[#allocation2 + $0x70] sm:$0xff]  ;;  %v2215_v40 = vadd.f32 %v2580_v21, %v2195_v14 }
 0x2ed   : > { %2222 = vst [vmem:[#allocation11 + $0x10] sm:$0xff] %v2206_v45  ;;  %v2211_v42 = vadd.f32 %v2580_v21, %v2191_v12  ;;  %v2198_v23 = vld [vmem:[#allocation2 + $0x78] sm:$0xff]  ;;  %v2216_v59 = vadd.f32 %v2580_v21, %v2196_v25  ;;  %v2217_v46 = vadd.f32 %v2580_v21, %v2197_v37 }
 0x2ee   : > { %2223 = vst [vmem:[#allocation11 + $0x18] sm:$0xff] %v2207_v60  ;;  %v2199_v34 = vld [vmem:[#allocation2 + $0x28] sm:$0xff]  ;;  %v2218_v22 = vadd.f32 %v2580_v21, %v2198_v23 }
 0x2ef   : > { %2224 = vst [vmem:[#allocation11 + $0x20] sm:$0xff] %v2208_v39  ;;  %v2219_v51 = vadd.f32 %v2580_v21, %v2199_v34 }
 0x2f0   : > { %2225 = vst [vmem:[#allocation11 + $0x28] sm:$0xff] %v2209_v28 }
 0x2f1   : > { %2226 = vst [vmem:[#allocation11 + $0x30] sm:$0xff] %v2210_v17 }
 0x2f2   : > { %2227 = vst [vmem:[#allocation11 + $0x38] sm:$0xff] %v2211_v42 }
 0x2f3   : > { %2228 = vst [vmem:[#allocation11 + $0x40] sm:$0xff] %v2212_v16 }
 0x2f4   : > { %2229 = vst [vmem:[#allocation11 + $0x48] sm:$0xff] %v2213_v3 }
 0x2f5   : > { %2230 = vst [vmem:[#allocation11 + $0x50] sm:$0xff] %v2214_v56 }
 0x2f6   : > { %2231 = vst [vmem:[#allocation11 + $0x58] sm:$0xff] %v2215_v40 }
 0x2f7   : > { %2232 = vst [vmem:[#allocation11 + $0x60] sm:$0xff] %v2216_v59 }
 0x2f8   : > { %2233 = vst [vmem:[#allocation11 + $0x68] sm:$0xff] %v2217_v46 }
 0x2f9   : > { %2234 = vst [vmem:[#allocation11 + $0x70] sm:$0xff] %v2218_v22 }
 0x2fa   : > { %2235 = vst [vmem:[#allocation11 + $0x78] sm:$0xff] %v2219_v51 }
 0x2fb PF: > { %p2456_p3 = scmp.eq.s32.totalorder %s2905_s27, 1  ;;  %s2246_s9 = sshll.u32 %s4306_s5, 4  ;;  %s2247_s9 = int_to_ptr.hbm [resolvable:$true] %s2246_s9 }
 0x2fc   : > { %s2800_s10 = smov [#allocation11]   ;;  %s2801_s17 = smov 128  }
 0x2fd   : > { %s2244_s11 = sshll.u32 %s2800_s10, 4  ;;  %s2802_s25 = smov 8   ;;  %s2245_s11 = int_to_ptr.vmem [resolvable:$true] %s2244_s11 }
 0x2fe   : > { %2436 = dma.vmem_to_hbm [thread:$0]  (%p2456_p3), %s2245_s11, 2048, %s2247_s9, [#allocation5], %s2801_s17, %s2801_s17, %s2802_s25  }
 0x2ff   : > { %2766 = dma.done.wait (%p2456_p3), [#allocation5], 2048  }
 0x300   : > { %2768 = vsyncadd (%p2456_p3), [#allocation5], 4294965248 }
 0x301 PF: > { %s4398_s28 = sld [smem:[#allocation17_spill]]  ;;  %s4402_s18 = smov %s2775_s19 }
 0x302   : > { %s4399_s30 = sld [smem:[#allocation16_spill]]  ;;  %s4404_s21 = smov %s2787_s22 }
 0x303   : > { %s4400_s20 = sld [smem:[#allocation19_spill]] }
 0x304   : > { %s4401_s27 = sld [smem:[#allocation18_spill]] }
 0x307   : > { %s23_s23 = sadd.s32 1, %s4398_s28  }
 0x308   : > { %p20_p4 = scmp.ge.s32.totalorder %s23_s23, 4   ;;  %s4403_s19 = smov %s4399_s30 }
 0x30a   : > { %s4405_s22 = smov %s4401_s27  ;;  %22 = sbr.rel (!%p20_p4) target bundleno = 11 (0xb), region = 116 }
 0x30f   :  { %2263 = vsyncpa [#allocation4], 1 }
 0x310   :  { %2265 = vsyncpa [#allocation4 + $0x1], 1 }
 0x311   :  { %2266 = vsyncpa [#allocation7], 1 }
 0x312   :  { %2268 = vsyncpa [#allocation7 + $0x1], 1 }
 0x313   :  { %2269 = vsyncpa [#allocation10], 1 }
 0x314   :  { %2271 = vsyncpa [#allocation10 + $0x1], 1 }
 0x315   :  { %2272 = vsyncpa [#allocation5], 1 }
 0x316   :  { %2274 = vsyncpa [#allocation5 + $0x1], 1 }

</bundles_post_ra>
